<compile_context>
chip_gen: v5e
topology: v5e:2x2
jax: 0.10.0
libtpu: 0.0.40
codegen_flags: <defaults>
</compile_context>

<pallas_src>
import functools

import jax
import jax.numpy as jnp
from jax.experimental import pallas as pl
from jax.experimental.pallas import tpu as pltpu

_LANE = 128


def _round_up(x, m):
    return (x + m - 1) // m * m


def _pick_row_tile(n_p):
    for t in (512, 256, 128):
        if n_p % t == 0:
            return t
    return n_p


def _fused_sage_kernel(a_hbm, x_ref, *rest, num_layers, fin_p, fouts_p, row_tile):
    """All SAGEConv('mean') layers fused; A streamed once, then VMEM-resident.

    rest = (w_cat_0, bias_0, ..., w_cat_{L-1}, bias_{L-1},
            out_ref, a_vmem, h_vmem, dinv_ref, sem)
    Per layer:  h_neigh = (A @ h) * deg_inv
                h       = concat([h, h_neigh]) @ W_cat + bias   (ReLU except last)
    """
    n_w = 2 * num_layers
    layer_refs = rest[:n_w]
    o_ref = rest[n_w]
    a_vmem, h_vmem, dinv_ref, sem = rest[n_w + 1:]

    n_p = a_vmem.shape[0]
    n_r = n_p // row_tile

    # 1) Kick off all row-slab DMAs of A (HBM -> resident VMEM copy).  They are
    #    overlapped with the streamed layer-1 compute below.
    copies = []
    for r in range(n_r):
        cp = pltpu.make_async_copy(
            a_hbm.at[pl.ds(r * row_tile, row_tile)],
            a_vmem.at[pl.ds(r * row_tile, row_tile)],
            sem.at[r])
        cp.start()
        copies.append(cp)

    w0 = layer_refs[0][...]                       # [2*fin_p, fouts_p[0]] bf16
    b0 = layer_refs[1][...]                       # [1, fouts_p[0]] f32
    x_full = x_ref[...]                           # [n_p, fin_p] bf16, last col == 1

    # 2) Layer 1, streamed over row tiles of A while A lands in VMEM.
    for r in range(n_r):
        r0 = r * row_tile
        copies[r].wait()
        a_rows = a_vmem[r0:r0 + row_tile, :]                      # bf16 0/1 (exact)
        # Neighbour sums; the all-ones padding column of x makes agg[:, -1] the
        # exact in-degree (no f32 copy of A, no extra MXU pass).
        agg = jnp.dot(a_rows, x_full, preferred_element_type=jnp.float32)
        deg = agg[:, fin_p - 1:fin_p]                             # [tr, 1] f32, exact
        dinv = jnp.where(deg > 0.0, 1.0 / jnp.maximum(deg, 1.0), 0.0)
        dinv_ref[r0:r0 + row_tile, :] = dinv                      # reused by layers 2..L
        h_neigh = (agg * dinv).astype(jnp.bfloat16)

        x_rows = x_ref[r0:r0 + row_tile, :]
        cat = jnp.concatenate([x_rows, h_neigh], axis=-1)         # [tr, 2*fin_p] bf16
        out = jnp.dot(cat, w0, preferred_element_type=jnp.float32) + b0
        if num_layers == 1:
            o_ref[r0:r0 + row_tile, :] = out.astype(o_ref.dtype)
        else:
            out = jnp.maximum(out, 0.0)     # ReLU; dropout(0.5) is identity in eval
            h_vmem[r0:r0 + row_tile, :] = out.astype(jnp.bfloat16)

    # 3) Layers 2..L on the now fully-resident A; activations carried in bf16.
    if num_layers > 1:
        a_full = a_vmem[...]                                      # [n_p, n_p] bf16
        dinv_full = dinv_ref[...]                                 # [n_p, 1] f32
        h = h_vmem[...]                                           # [n_p, fouts_p[0]] bf16
        for l in range(1, num_layers):
            w = layer_refs[2 * l][...]
            b = layer_refs[2 * l + 1][...]
            agg = jnp.dot(a_full, h, preferred_element_type=jnp.float32)
            h_neigh = (agg * dinv_full).astype(jnp.bfloat16)
            cat = jnp.concatenate([h, h_neigh], axis=-1)
            out = jnp.dot(cat, w, preferred_element_type=jnp.float32) + b
            if l != num_layers - 1:
                h = jnp.maximum(out, 0.0).astype(jnp.bfloat16)
            else:
                o_ref[...] = out.astype(o_ref.dtype)


def _vmem_bytes_estimate(n_p, fin_p, fouts_p, num_layers):
    """Rough resident-footprint estimate (bytes) used for vmem_limit_bytes."""
    hid_max = max([fin_p] + list(fouts_p))
    b = n_p * n_p * 2                               # resident A scratch (bf16)
    b += 2 * n_p * fin_p * 2                        # x input (margin x2)
    prev = fin_p
    for fo in fouts_p:
        b += 2 * (2 * prev * fo * 2 + fo * 4)       # W_cat + bias (margin x2)
        prev = fo
    b += n_p * (fouts_p[0] if num_layers > 1 else _LANE) * 2   # h scratch
    b += n_p * _LANE * 4                            # deg_inv scratch (lane padded)
    b += 2 * n_p * fouts_p[-1] * 4                  # f32 output (margin x2)
    # live temporaries: agg/out f32, h_neigh bf16, cat bf16
    b += n_p * hid_max * (4 + 4 + 2) + n_p * 2 * hid_max * 2
    return b


@jax.jit
def gnn_forward(A, x, params):
    """GNN.forward(blocks=A, x): same dense adjacency [dst, src] for every layer."""
    N, f_in = x.shape
    num_layers = len(params)

    n_p = _round_up(N, _LANE)
    # Pad the feature axis so at least one spare column exists; that column is
    # set to 1.0 and rides the layer-1 aggregation matmul to yield the exact
    # in-degree for free (its W_cat rows are zero, so it never pollutes outputs).
    fin_p = _round_up(f_in + 1, _LANE)

    a_p = jnp.zeros((n_p, n_p), jnp.bfloat16).at[:N, :N].set(A.astype(jnp.bfloat16))
    x_p = (jnp.zeros((n_p, fin_p), jnp.bfloat16)
           .at[:N, :f_in].set(x.astype(jnp.bfloat16))
           .at[:, fin_p - 1].set(1.0))

    # Fuse per-layer weights: W_cat = concat([W_self, W_neigh], axis=0), 128-padded.
    flat_inputs = [a_p, x_p]
    prev_p = fin_p
    fouts_p = []
    for (w_self, w_neigh, bias) in params:
        fi, fo = w_self.shape
        fo_p = _round_up(fo, _LANE)
        w_cat = jnp.zeros((2 * prev_p, fo_p), jnp.bfloat16)
        w_cat = w_cat.at[:fi, :fo].set(w_self.astype(jnp.bfloat16))
        w_cat = w_cat.at[prev_p:prev_p + fi, :fo].set(w_neigh.astype(jnp.bfloat16))
        b_p = jnp.zeros((1, fo_p), jnp.float32).at[:, :fo].set(
            bias.reshape(1, -1).astype(jnp.float32))
        flat_inputs += [w_cat, b_p]
        fouts_p.append(fo_p)
        prev_p = fo_p

    f_out = params[-1][0].shape[1]
    f_out_p = fouts_p[-1]
    row_tile = _pick_row_tile(n_p)

    try:
        vmem_cap = int(pltpu.get_tpu_info().vmem_capacity_bytes)
    except Exception:  # conservative default (v7x per-TC VMEM)
        vmem_cap = 64 << 20

    est = _vmem_bytes_estimate(n_p, fin_p, fouts_p, num_layers)
    if est > int(0.9 * vmem_cap):
        # TODO(synk): per-layer (row-tile "parallel", k-tile "arbitrary") streaming
        # grid for graphs whose padded adjacency does not fit VMEM.
        raise NotImplementedError(
            f"graph too large for the VMEM-resident fused kernel "
            f"(~{est >> 20} MiB needed, {vmem_cap >> 20} MiB VMEM)")
    vmem_limit = int(min(vmem_cap, max(2 * est + (8 << 20), 32 << 20)))

    vmem = pl.BlockSpec(memory_space=pltpu.MemorySpace.VMEM)
    any_spec = pl.BlockSpec(memory_space=pl.ANY)
    kernel = functools.partial(
        _fused_sage_kernel, num_layers=num_layers, fin_p=fin_p,
        fouts_p=tuple(fouts_p), row_tile=row_tile)

    h_w = fouts_p[0] if num_layers > 1 else _LANE
    out_p = pl.pallas_call(
        kernel,
        out_shape=jax.ShapeDtypeStruct((n_p, f_out_p), jnp.float32),
        in_specs=[any_spec] + [vmem] * (len(flat_inputs) - 1),
        out_specs=vmem,
        scratch_shapes=[
            pltpu.VMEM((n_p, n_p), jnp.bfloat16),       # resident copy of A
            pltpu.VMEM((n_p, h_w), jnp.bfloat16),       # layer-1 activations
            pltpu.VMEM((n_p, 1), jnp.float32),          # 1/deg
            pltpu.SemaphoreType.DMA((n_p // row_tile,)),
        ],
        compiler_params=pltpu.CompilerParams(vmem_limit_bytes=vmem_limit),
    )(*flat_inputs)
    return out_p[:N, :f_out]


def init_params(key, in_size, hid_size, out_size, num_layers=3):
    dims = [in_size] + [hid_size] * (num_layers - 1) + [out_size]
    params = []
    for l in range(num_layers):
        f_in, f_out = dims[l], dims[l + 1]
        key, k1, k2 = jax.random.split(key, 3)
        scale = 1.0 / jnp.sqrt(jnp.float32(f_in))
        w_self = jax.random.normal(k1, (f_in, f_out), jnp.float32) * scale
        w_neigh = jax.random.normal(k2, (f_in, f_out), jnp.float32) * scale
        bias = jnp.zeros((1, f_out), jnp.float32)
        params.append((w_self, w_neigh, bias))
    return params


def _reference(A, x, params):
    """Pure-JAX f32 SAGEConv('mean') stack (eval mode)."""
    deg = jnp.sum(A, axis=1, keepdims=True)
    dinv = jnp.where(deg > 0.0, 1.0 / jnp.maximum(deg, 1.0), 0.0)
    h = x
    L = len(params)
    for l, (w_self, w_neigh, b) in enumerate(params):
        h_neigh = (A @ h) * dinv
        h = h @ w_self + h_neigh @ w_neigh + b
        if l != L - 1:
            h = jax.nn.relu(h)
    return h


if __name__ == "__main__":
    N = 128          # number of nodes
    IN_SIZE = 32
    HID_SIZE = 64
    OUT_SIZE = 16

    key = jax.random.PRNGKey(0)
    k_adj, k_x, k_param = jax.random.split(key, 3)

    # deterministic random sparse-ish graph as a dense adjacency [dst, src]
    A = (jax.random.uniform(k_adj, (N, N)) < 0.05).astype(jnp.float32)
    x = jax.random.normal(k_x, (N, IN_SIZE), jnp.float32)

    params = init_params(k_param, IN_SIZE, HID_SIZE, OUT_SIZE, num_layers=3)

    out = gnn_forward(A, x, params)
    out = jax.block_until_ready(out)
    assert out.shape == (N, OUT_SIZE)

    # bf16-on-MXU vs f32 reference: expect ~1e-2 relative agreement.
    ref = _reference(A, x, params)
    rel_err = float(jnp.max(jnp.abs(out - ref)) / (jnp.max(jnp.abs(ref)) + 1e-6))
    assert rel_err < 8e-2, f"kernel/reference mismatch: rel_err={rel_err}"
    print("KERNEL_OK")
</pallas_src>

<mosaic_0001>
module attributes {stable_mosaic.version = 11 : i64} {
  func.func @_fused_sage_kernel(%arg0: memref<128x128xbf16, #tpu.memory_space<any>>, %arg1: memref<128x128xbf16, #tpu.memory_space<vmem>>, %arg2: memref<256x128xbf16, #tpu.memory_space<vmem>>, %arg3: memref<1x128xf32, #tpu.memory_space<vmem>>, %arg4: memref<256x128xbf16, #tpu.memory_space<vmem>>, %arg5: memref<1x128xf32, #tpu.memory_space<vmem>>, %arg6: memref<256x128xbf16, #tpu.memory_space<vmem>>, %arg7: memref<1x128xf32, #tpu.memory_space<vmem>>, %arg8: memref<128x128xf32, #tpu.memory_space<vmem>>, %arg9: memref<128x128xbf16, #tpu.memory_space<vmem>>, %arg10: memref<128x128xbf16, #tpu.memory_space<vmem>>, %arg11: memref<128x1xf32, #tpu.memory_space<vmem>>, %arg12: memref<1x!tpu.dma_semaphore, #tpu.memory_space<semaphore_mem>>) attributes {dimension_semantics = [], scalar_prefetch = 0 : i64, scratch_operands = 4 : i64, tpu.core_type = #tpu.core_type<tc>} {
    %c0_i32 = arith.constant 0 : i32
    %c0_i32_0 = arith.constant 0 : i32
    %c0_i32_1 = arith.constant 0 : i32
    %0 = tpu.memref_slice %arg0[%c0_i32_0, %c0_i32_1] : memref<128x128xbf16, #tpu.memory_space<any>> -> memref<128x128xbf16, #tpu.memory_space<any>>
    %c0_i32_2 = arith.constant 0 : i32
    %c0_i32_3 = arith.constant 0 : i32
    %1 = tpu.memref_slice %arg9[%c0_i32_2, %c0_i32_3] : memref<128x128xbf16, #tpu.memory_space<vmem>> -> memref<128x128xbf16, #tpu.memory_space<vmem>>
    %2 = tpu.memref_slice %arg12[%c0_i32] : memref<1x!tpu.dma_semaphore, #tpu.memory_space<semaphore_mem>> -> memref<1x!tpu.dma_semaphore, #tpu.memory_space<semaphore_mem>>
    %3 = tpu.memref_squeeze %2 : memref<1x!tpu.dma_semaphore, #tpu.memory_space<semaphore_mem>> -> memref<!tpu.dma_semaphore, #tpu.memory_space<semaphore_mem>>
    tpu.enqueue_dma source(%0 : memref<128x128xbf16, #tpu.memory_space<any>>) target(%1 : memref<128x128xbf16, #tpu.memory_space<vmem>>) target_semaphore(%3 : memref<!tpu.dma_semaphore, #tpu.memory_space<semaphore_mem>>)
    %c0 = arith.constant 0 : index
    %c0_4 = arith.constant 0 : index
    %4 = vector.load %arg2[%c0, %c0_4] : memref<256x128xbf16, #tpu.memory_space<vmem>>, vector<256x128xbf16>
    %c0_5 = arith.constant 0 : index
    %c0_6 = arith.constant 0 : index
    %5 = vector.load %arg3[%c0_5, %c0_6] : memref<1x128xf32, #tpu.memory_space<vmem>>, vector<1x128xf32>
    %c0_7 = arith.constant 0 : index
    %c0_8 = arith.constant 0 : index
    %6 = vector.load %arg1[%c0_7, %c0_8] : memref<128x128xbf16, #tpu.memory_space<vmem>>, vector<128x128xbf16>
    %c0_i32_9 = arith.constant 0 : i32
    %c0_i32_10 = arith.constant 0 : i32
    %c0_i32_11 = arith.constant 0 : i32
    %7 = tpu.memref_slice %arg0[%c0_i32_10, %c0_i32_11] : memref<128x128xbf16, #tpu.memory_space<any>> -> memref<128x128xbf16, #tpu.memory_space<any>>
    %c0_i32_12 = arith.constant 0 : i32
    %c0_i32_13 = arith.constant 0 : i32
    %8 = tpu.memref_slice %arg9[%c0_i32_12, %c0_i32_13] : memref<128x128xbf16, #tpu.memory_space<vmem>> -> memref<128x128xbf16, #tpu.memory_space<vmem>>
    %9 = tpu.memref_slice %arg12[%c0_i32_9] : memref<1x!tpu.dma_semaphore, #tpu.memory_space<semaphore_mem>> -> memref<1x!tpu.dma_semaphore, #tpu.memory_space<semaphore_mem>>
    %10 = tpu.memref_squeeze %9 : memref<1x!tpu.dma_semaphore, #tpu.memory_space<semaphore_mem>> -> memref<!tpu.dma_semaphore, #tpu.memory_space<semaphore_mem>>
    tpu.wait_dma2 semaphore(%10 : memref<!tpu.dma_semaphore, #tpu.memory_space<semaphore_mem>>) src(%7 : memref<128x128xbf16, #tpu.memory_space<any>>) dst(%8 : memref<128x128xbf16, #tpu.memory_space<vmem>>)
    %c0_14 = arith.constant 0 : index
    %c0_15 = arith.constant 0 : index
    %11 = vector.load %arg9[%c0_14, %c0_15] : memref<128x128xbf16, #tpu.memory_space<vmem>>, vector<128x128xbf16>
    %cst = arith.constant dense<0.000000e+00> : vector<128x128xf32>
    %12 = tpu.matmul %11, %6, %cst {dimension_numbers = #tpu.dot_dimension_numbers<[1], [0], [0], [1], [0, 0, 1, 1], [], []>} : vector<128x128xbf16>, vector<128x128xbf16>, vector<128x128xf32> -> vector<128x128xf32>
    %13 = vector.extract_strided_slice %12 {offsets = [0, 127], sizes = [128, 1], strides = [1, 1]} : vector<128x128xf32> to vector<128x1xf32>
    %cst_16 = arith.constant 0.000000e+00 : f32
    %14 = vector.broadcast %cst_16 : f32 to vector<128x1xf32>
    %15 = arith.cmpf ogt, %13, %14 : vector<128x1xf32>
    %cst_17 = arith.constant 1.000000e+00 : f32
    %16 = vector.broadcast %cst_17 : f32 to vector<128x1xf32>
    %17 = arith.maximumf %13, %16 : vector<128x1xf32>
    %cst_18 = arith.constant 1.000000e+00 : f32
    %18 = vector.broadcast %cst_18 : f32 to vector<128x1xf32>
    %19 = arith.divf %18, %17 : vector<128x1xf32>
    %cst_19 = arith.constant 0.000000e+00 : f32
    %20 = vector.broadcast %cst_19 : f32 to vector<128x1xf32>
    %21 = arith.select %15, %19, %20 : vector<128x1xi1>, vector<128x1xf32>
    %c0_20 = arith.constant 0 : index
    %c0_21 = arith.constant 0 : index
    %22 = vector.load %arg11[%c0_20, %c0_21] : memref<128x1xf32, #tpu.memory_space<vmem>>, vector<128x1xf32>
    tpu.vector_store %arg11[%c0_20, %c0_21], %21 {strides = array<i32>} : memref<128x1xf32, #tpu.memory_space<vmem>>, vector<128x1xf32>,
    %23 = vector.broadcast %21 : vector<128x1xf32> to vector<128x128xf32>
    %24 = arith.mulf %12, %23 : vector<128x128xf32>
    %25 = arith.truncf %24 : vector<128x128xf32> to vector<128x128xbf16>
    %c0_22 = arith.constant 0 : index
    %c0_23 = arith.constant 0 : index
    %26 = vector.load %arg1[%c0_22, %c0_23] : memref<128x128xbf16, #tpu.memory_space<vmem>>, vector<128x128xbf16>
    %27 = tpu.concatenate %26, %25 in 1 : vector<128x128xbf16>, vector<128x128xbf16> -> vector<128x256xbf16>
    %cst_24 = arith.constant dense<0.000000e+00> : vector<128x128xf32>
    %28 = tpu.matmul %27, %4, %cst_24 {dimension_numbers = #tpu.dot_dimension_numbers<[1], [0], [0], [1], [0, 0, 1, 1], [], []>} : vector<128x256xbf16>, vector<256x128xbf16>, vector<128x128xf32> -> vector<128x128xf32>
    %29 = vector.broadcast %5 : vector<1x128xf32> to vector<128x128xf32>
    %30 = arith.addf %28, %29 : vector<128x128xf32>
    %cst_25 = arith.constant 0.000000e+00 : f32
    %31 = vector.broadcast %cst_25 : f32 to vector<128x128xf32>
    %32 = arith.maximumf %30, %31 : vector<128x128xf32>
    %33 = arith.truncf %32 : vector<128x128xf32> to vector<128x128xbf16>
    %c0_26 = arith.constant 0 : index
    %c0_27 = arith.constant 0 : index
    %34 = vector.load %arg10[%c0_26, %c0_27] : memref<128x128xbf16, #tpu.memory_space<vmem>>, vector<128x128xbf16>
    tpu.vector_store %arg10[%c0_26, %c0_27], %33 {strides = array<i32>} : memref<128x128xbf16, #tpu.memory_space<vmem>>, vector<128x128xbf16>,
    %c0_28 = arith.constant 0 : index
    %c0_29 = arith.constant 0 : index
    %35 = vector.load %arg9[%c0_28, %c0_29] : memref<128x128xbf16, #tpu.memory_space<vmem>>, vector<128x128xbf16>
    %c0_30 = arith.constant 0 : index
    %c0_31 = arith.constant 0 : index
    %36 = vector.load %arg11[%c0_30, %c0_31] : memref<128x1xf32, #tpu.memory_space<vmem>>, vector<128x1xf32>
    %c0_32 = arith.constant 0 : index
    %c0_33 = arith.constant 0 : index
    %37 = vector.load %arg10[%c0_32, %c0_33] : memref<128x128xbf16, #tpu.memory_space<vmem>>, vector<128x128xbf16>
    %c0_34 = arith.constant 0 : index
    %c0_35 = arith.constant 0 : index
    %38 = vector.load %arg4[%c0_34, %c0_35] : memref<256x128xbf16, #tpu.memory_space<vmem>>, vector<256x128xbf16>
    %c0_36 = arith.constant 0 : index
    %c0_37 = arith.constant 0 : index
    %39 = vector.load %arg5[%c0_36, %c0_37] : memref<1x128xf32, #tpu.memory_space<vmem>>, vector<1x128xf32>
    %cst_38 = arith.constant dense<0.000000e+00> : vector<128x128xf32>
    %40 = tpu.matmul %35, %37, %cst_38 {dimension_numbers = #tpu.dot_dimension_numbers<[1], [0], [0], [1], [0, 0, 1, 1], [], []>} : vector<128x128xbf16>, vector<128x128xbf16>, vector<128x128xf32> -> vector<128x128xf32>
    %41 = vector.broadcast %36 : vector<128x1xf32> to vector<128x128xf32>
    %42 = arith.mulf %40, %41 : vector<128x128xf32>
    %43 = arith.truncf %42 : vector<128x128xf32> to vector<128x128xbf16>
    %44 = tpu.concatenate %37, %43 in 1 : vector<128x128xbf16>, vector<128x128xbf16> -> vector<128x256xbf16>
    %cst_39 = arith.constant dense<0.000000e+00> : vector<128x128xf32>
    %45 = tpu.matmul %44, %38, %cst_39 {dimension_numbers = #tpu.dot_dimension_numbers<[1], [0], [0], [1], [0, 0, 1, 1], [], []>} : vector<128x256xbf16>, vector<256x128xbf16>, vector<128x128xf32> -> vector<128x128xf32>
    %46 = vector.broadcast %39 : vector<1x128xf32> to vector<128x128xf32>
    %47 = arith.addf %45, %46 : vector<128x128xf32>
    %cst_40 = arith.constant 0.000000e+00 : f32
    %48 = vector.broadcast %cst_40 : f32 to vector<128x128xf32>
    %49 = arith.maximumf %47, %48 : vector<128x128xf32>
    %50 = arith.truncf %49 : vector<128x128xf32> to vector<128x128xbf16>
    %c0_41 = arith.constant 0 : index
    %c0_42 = arith.constant 0 : index
    %51 = vector.load %arg6[%c0_41, %c0_42] : memref<256x128xbf16, #tpu.memory_space<vmem>>, vector<256x128xbf16>
    %c0_43 = arith.constant 0 : index
    %c0_44 = arith.constant 0 : index
    %52 = vector.load %arg7[%c0_43, %c0_44] : memref<1x128xf32, #tpu.memory_space<vmem>>, vector<1x128xf32>
    %cst_45 = arith.constant dense<0.000000e+00> : vector<128x128xf32>
    %53 = tpu.matmul %35, %50, %cst_45 {dimension_numbers = #tpu.dot_dimension_numbers<[1], [0], [0], [1], [0, 0, 1, 1], [], []>} : vector<128x128xbf16>, vector<128x128xbf16>, vector<128x128xf32> -> vector<128x128xf32>
    %54 = vector.broadcast %36 : vector<128x1xf32> to vector<128x128xf32>
    %55 = arith.mulf %53, %54 : vector<128x128xf32>
    %56 = arith.truncf %55 : vector<128x128xf32> to vector<128x128xbf16>
    %57 = tpu.concatenate %50, %56 in 1 : vector<128x128xbf16>, vector<128x128xbf16> -> vector<128x256xbf16>
    %cst_46 = arith.constant dense<0.000000e+00> : vector<128x128xf32>
    %58 = tpu.matmul %57, %51, %cst_46 {dimension_numbers = #tpu.dot_dimension_numbers<[1], [0], [0], [1], [0, 0, 1, 1], [], []>} : vector<128x256xbf16>, vector<256x128xbf16>, vector<128x128xf32> -> vector<128x128xf32>
    %59 = vector.broadcast %52 : vector<1x128xf32> to vector<128x128xf32>
    %60 = arith.addf %58, %59 : vector<128x128xf32>
    %c0_47 = arith.constant 0 : index
    %c0_48 = arith.constant 0 : index
    %61 = vector.load %arg8[%c0_47, %c0_48] : memref<128x128xf32, #tpu.memory_space<vmem>>, vector<128x128xf32>
    tpu.vector_store %arg8[%c0_47, %c0_48], %60 {strides = array<i32>} : memref<128x128xf32, #tpu.memory_space<vmem>>, vector<128x128xf32>,
    return
  }
}

</mosaic_0001>

<bundles_post_ra>
// kernel: gnn_forward.1
= control target key start
LH: loop header
LB: loop body
LE: loop exit
PB: predicated region body
PF: predicated region fallthrough
CT: control target
= control target key end

     0   :  { %s3951_s0 = inlined_call_operand.vmem [shape: bf16[128,128], index: 0, kind: input, shape index: {}]   ;;  %s3952_s1 = inlined_call_operand.vmem [shape: bf16[128,128], index: 1, kind: input, shape index: {}]   ;;  %s3953_s2 = inlined_call_operand.vmem [shape: bf16[256,128], index: 2, kind: input, shape index: {}]   ;;  %s3954_s3 = inlined_call_operand.vmem [shape: f32[1,128], index: 3, kind: input, shape index: {}]   ;;  %s3955_s4 = inlined_call_operand.vmem [shape: bf16[256,128], index: 4, kind: input, shape index: {}]   ;;  %s3956_s5 = inlined_call_operand.vmem [shape: f32[1,128], index: 5, kind: input, shape index: {}]   ;;  %s3957_s6 = inlined_call_operand.vmem [shape: bf16[256,128], index: 6, kind: input, shape index: {}]   ;;  %s3958_s7 = inlined_call_operand.vmem [shape: f32[1,128], index: 7, kind: input, shape index: {}]   ;;  %s3959_s8 = inlined_call_operand.vmem [shape: f32[128,128], index: 8, kind: output, shape index: {}]  }
   0x1   :  { %v37_v0 = vld [vmem:[%s3951_s0] sm:$0xff]  ;;  %v39_v1 = vld [vmem:[%s3951_s0 + $0x8] sm:$0xff]  ;;  %v41_v2 = vld [vmem:[%s3951_s0 + $0x10] sm:$0xff] }
   0x2   :  { %38 = vst [vmem:[#allocation2 + $0x30] sm:$0xff] %v37_v0  ;;  %v43_v3 = vld [vmem:[%s3951_s0 + $0x18] sm:$0xff]  ;;  %v45_v4 = vld [vmem:[%s3951_s0 + $0x20] sm:$0xff]  ;;  %v47_v5 = vld [vmem:[%s3951_s0 + $0x28] sm:$0xff] }
   0x3   :  { %40 = vst [vmem:[#allocation2] sm:$0xff] %v39_v1  ;;  %v49_v6 = vld [vmem:[%s3951_s0 + $0x30] sm:$0xff]  ;;  %v51_v7 = vld [vmem:[%s3951_s0 + $0x38] sm:$0xff] }
   0x4   :  { %42 = vst [vmem:[#allocation2 + $0x18] sm:$0xff] %v41_v2 }
   0x5   :  { %44 = vst [vmem:[#allocation2 + $0x10] sm:$0xff] %v43_v3 }
   0x6   :  { %46 = vst [vmem:[#allocation2 + $0x8] sm:$0xff] %v45_v4 }
   0x7   :  { %48 = vst [vmem:[#allocation2 + $0x20] sm:$0xff] %v47_v5 }
   0x8   :  { %50 = vst [vmem:[#allocation2 + $0x28] sm:$0xff] %v49_v6 }
   0x9   :  { %52 = vst [vmem:[#allocation2 + $0x38] sm:$0xff] %v51_v7 }
   0xa   :  { %58 = vsyncadd [#allocation5], 1024  ;;  %v2779_v8 = vld [vmem:[%s3953_s2] sm:$0xf]  ;;  %v2784_v9 = vld [vmem:[%s3953_s2] sm:$0xf0] }
   0xb   :  { %3966 = vst [vmem:[#allocation8_spill] sm:$0xff] %v2779_v8  ;;  %v2789_v10 = vld [vmem:[%s3953_s2 + $0x8] sm:$0xf]  ;;  %v2794_v11 = vld [vmem:[%s3953_s2 + $0x8] sm:$0xf0] }
   0xc   :  { %3967 = vst [vmem:[#allocation9_spill] sm:$0xff] %v2784_v9  ;;  %v2799_v12 = vld [vmem:[%s3953_s2 + $0x10] sm:$0xf]  ;;  %v2804_v13 = vld [vmem:[%s3953_s2 + $0x10] sm:$0xf0] }
   0xd   :  { %3968 = vst [vmem:[#allocation10_spill] sm:$0xff] %v2789_v10  ;;  %v2809_v14 = vld [vmem:[%s3953_s2 + $0x18] sm:$0xf]  ;;  %v2814_v15 = vld [vmem:[%s3953_s2 + $0x18] sm:$0xf0] }
   0xe   :  { %3969 = vst [vmem:[#allocation11_spill] sm:$0xff] %v2794_v11  ;;  %v2819_v16 = vld [vmem:[%s3953_s2 + $0x20] sm:$0xf]  ;;  %v2824_v17 = vld [vmem:[%s3953_s2 + $0x20] sm:$0xf0] }
   0xf   :  { %3970 = vst [vmem:[#allocation12_spill] sm:$0xff] %v2799_v12  ;;  %v2829_v18 = vld [vmem:[%s3953_s2 + $0x28] sm:$0xf]  ;;  %v2834_v19 = vld [vmem:[%s3953_s2 + $0x28] sm:$0xf0] }
  0x10   :  { %3971 = vst [vmem:[#allocation13_spill] sm:$0xff] %v2804_v13  ;;  %v2839_v20 = vld [vmem:[%s3953_s2 + $0x30] sm:$0xf]  ;;  %v2844_v21 = vld [vmem:[%s3953_s2 + $0x30] sm:$0xf0] }
  0x11   :  { %3972 = vst [vmem:[#allocation14_spill] sm:$0xff] %v2814_v15  ;;  %v2849_v22 = vld [vmem:[%s3953_s2 + $0x38] sm:$0xf]  ;;  %v2854_v23 = vld [vmem:[%s3953_s2 + $0x38] sm:$0xf0] }
  0x12   :  { %v2859_v24 = vld [vmem:[%s3953_s2 + $0x40] sm:$0xf]  ;;  %v2864_v25 = vld [vmem:[%s3953_s2 + $0x40] sm:$0xf0]  ;;  %v2869_v26 = vld [vmem:[%s3953_s2 + $0x48] sm:$0xf] }
  0x13   :  { %3973 = vst [vmem:[#allocation15_spill] sm:$0xff] %v2859_v24  ;;  %v2874_v27 = vld [vmem:[%s3953_s2 + $0x48] sm:$0xf0]  ;;  %v2879_v28 = vld [vmem:[%s3953_s2 + $0x50] sm:$0xf] }
  0x14   :  { %3974 = vst [vmem:[#allocation16_spill] sm:$0xff] %v2864_v25  ;;  %v2884_v29 = vld [vmem:[%s3953_s2 + $0x50] sm:$0xf0]  ;;  %v2889_v30 = vld [vmem:[%s3953_s2 + $0x58] sm:$0xf] }
  0x15   :  { %3975 = vst [vmem:[#allocation17_spill] sm:$0xff] %v2869_v26  ;;  %v2894_v31 = vld [vmem:[%s3953_s2 + $0x58] sm:$0xf0]  ;;  %v2899_v32 = vld [vmem:[%s3953_s2 + $0x60] sm:$0xf] }
  0x16   :  { %3976 = vst [vmem:[#allocation18_spill] sm:$0xff] %v2874_v27  ;;  %v2904_v33 = vld [vmem:[%s3953_s2 + $0x60] sm:$0xf0]  ;;  %v2909_v34 = vld [vmem:[%s3953_s2 + $0x68] sm:$0xf] }
  0x17   :  { %3977 = vst [vmem:[#allocation19_spill] sm:$0xff] %v2879_v28  ;;  %v2914_v35 = vld [vmem:[%s3953_s2 + $0x68] sm:$0xf0]  ;;  %v2919_v36 = vld [vmem:[%s3953_s2 + $0x70] sm:$0xf] }
  0x18   :  { %3978 = vst [vmem:[#allocation20_spill] sm:$0xff] %v2884_v29  ;;  %v2924_v37 = vld [vmem:[%s3953_s2 + $0x70] sm:$0xf0]  ;;  %v2929_v38 = vld [vmem:[%s3953_s2 + $0x78] sm:$0xf] }
  0x19   :  { %3979 = vst [vmem:[#allocation21_spill] sm:$0xff] %v2889_v30  ;;  %v2934_v39 = vld [vmem:[%s3953_s2 + $0x78] sm:$0xf0]  ;;  %v2939_v40 = vld [vmem:[%s3954_s3] sm:$0x1] }
  0x1a   :  { %3980 = vst [vmem:[#allocation22_spill] sm:$0xff] %v2894_v31  ;;  %v2181_v41 = vld [vmem:[%s3952_s1] sm:$0xf]  ;;  %v2516_v42 = vld [vmem:[%s3952_s1] sm:$0xf0] }
  0x1b   :  { %3981 = vst [vmem:[#allocation23_spill] sm:$0xff] %v2899_v32  ;;  %v2185_v43 = vld [vmem:[%s3952_s1 + $0x8] sm:$0xf]  ;;  %v2517_v44 = vld [vmem:[%s3952_s1 + $0x8] sm:$0xf0] }
  0x1c   :  { %3982 = vst [vmem:[#allocation24_spill] sm:$0xff] %v2904_v33  ;;  %v2189_v45 = vld [vmem:[%s3952_s1 + $0x10] sm:$0xf]  ;;  %v2518_v46 = vld [vmem:[%s3952_s1 + $0x10] sm:$0xf0] }
  0x1d   :  { %3983 = vst [vmem:[#allocation25_spill] sm:$0xff] %v2939_v40  ;;  %v2193_v47 = vld [vmem:[%s3952_s1 + $0x18] sm:$0xf]  ;;  %v2519_v48 = vld [vmem:[%s3952_s1 + $0x18] sm:$0xf0] }
  0x1e   :  { %v2197_v49 = vld [vmem:[%s3952_s1 + $0x20] sm:$0xf]  ;;  %v2520_v50 = vld [vmem:[%s3952_s1 + $0x20] sm:$0xf0]  ;;  %v2201_v51 = vld [vmem:[%s3952_s1 + $0x28] sm:$0xf] }
  0x1f   :  { %v2521_v52 = vld [vmem:[%s3952_s1 + $0x28] sm:$0xf0]  ;;  %v2205_v53 = vld [vmem:[%s3952_s1 + $0x30] sm:$0xf]  ;;  %v2522_v54 = vld [vmem:[%s3952_s1 + $0x30] sm:$0xf0] }
  0x20   :  { %v2209_v55 = vld [vmem:[%s3952_s1 + $0x38] sm:$0xf]  ;;  %v2523_v56 = vld [vmem:[%s3952_s1 + $0x38] sm:$0xf0] }
  0x21   :  { %v2210_v57 = vor.u32 %v2523_v56, %v2209_v55 }
  0x22   :  { %2702 = dma.done.wait [#allocation5], 1024 }
  0x23   :  { %2703 = vsyncadd [#allocation5], 4294966272  ;;  %224 = vmatpush.bf16.msra.mxu0 %v2210_v57  ;;  %2635 = vmatpush.bf16.msra.mxu1 %v2210_v57  ;;  %v2206_v58 = vor.u32 %v2522_v54, %v2205_v53  ;;  %v2202_v59 = vor.u32 %v2521_v52, %v2201_v51  ;;  %v2198_v60 = vor.u32 %v2520_v50, %v2197_v49  ;;  %v2524_v1 = vld [vmem:[#allocation2 + $0x30] sm:$0xff]  ;;  %v2526_v2 = vld [vmem:[#allocation2 + $0x18] sm:$0xff]  ;;  %s2705_s2 = smov 1  }
  0x24   :  { %2636 = vmatpush.bf16.msra.mxu2 %v2210_v57  ;;  %2637 = vmatpush.bf16.msra.mxu3 %v2210_v57  ;;  %v2194_v61 = vor.u32 %v2519_v48, %v2193_v47  ;;  %v2190_v62 = vor.u32 %v2518_v46, %v2189_v45  ;;  %v2186_v63 = vor.u32 %v2517_v44, %v2185_v43  ;;  %v2528_v3 = vld [vmem:[#allocation2 + $0x8] sm:$0xff]  ;;  %v2525_v5 = vld [vmem:[#allocation2] sm:$0xff]  ;;  %v2527_v6 = vld [vmem:[#allocation2 + $0x10] sm:$0xff] }
  0x25   :  { %v2182_v0 = vor.u32 %v2516_v42, %v2181_v41  ;;  %v2530_v4 = vld [vmem:[#allocation2 + $0x28] sm:$0xff]  ;;  %v2529_v7 = vld [vmem:[#allocation2 + $0x20] sm:$0xff]  ;;  %v2531_v43 = vld [vmem:[#allocation2 + $0x38] sm:$0xff]  ;;  %v2704_v41 = vmov 127  }
  0x26   :  { %2664 = vset.pattern.permute.xlu2 %v2704_v41  ;;  %2662 = vset.pattern.permute.xlu0 %v2704_v41 }
  0x27   :  { %225 = vmatpush.bf16.msra.mxu0 %v2206_v58  ;;  %2638 = vmatpush.bf16.msra.mxu1 %v2206_v58 }
  0x28   :  { %2639 = vmatpush.bf16.msra.mxu2 %v2206_v58  ;;  %2640 = vmatpush.bf16.msra.mxu3 %v2206_v58 }
  0x29   :  { %2663 = vset.pattern.permute.xlu1 %v2704_v41 }
  0x2b   :  { %226 = vmatpush.bf16.msra.mxu0 %v2202_v59  ;;  %2641 = vmatpush.bf16.msra.mxu1 %v2202_v59 }
  0x2c   :  { %2642 = vmatpush.bf16.msra.mxu2 %v2202_v59  ;;  %2643 = vmatpush.bf16.msra.mxu3 %v2202_v59 }
  0x2f   :  { %227 = vmatpush.bf16.msra.mxu0 %v2198_v60  ;;  %2644 = vmatpush.bf16.msra.mxu1 %v2198_v60 }
  0x30   :  { %2645 = vmatpush.bf16.msra.mxu2 %v2198_v60  ;;  %2646 = vmatpush.bf16.msra.mxu3 %v2198_v60 }
  0x33   :  { %228 = vmatpush.bf16.msra.mxu0 %v2194_v61  ;;  %2647 = vmatpush.bf16.msra.mxu1 %v2194_v61 }
  0x34   :  { %2648 = vmatpush.bf16.msra.mxu2 %v2194_v61  ;;  %2649 = vmatpush.bf16.msra.mxu3 %v2194_v61 }
  0x37   :  { %229 = vmatpush.bf16.msra.mxu0 %v2190_v62  ;;  %2650 = vmatpush.bf16.msra.mxu1 %v2190_v62 }
  0x38   :  { %2651 = vmatpush.bf16.msra.mxu2 %v2190_v62  ;;  %2652 = vmatpush.bf16.msra.mxu3 %v2190_v62 }
  0x3b   :  { %230 = vmatpush.bf16.msra.mxu0 %v2186_v63  ;;  %2653 = vmatpush.bf16.msra.mxu1 %v2186_v63 }
  0x3c   :  { %2654 = vmatpush.bf16.msra.mxu2 %v2186_v63  ;;  %2655 = vmatpush.bf16.msra.mxu3 %v2186_v63 }
  0x3f   :  { %231 = vmatpush.bf16.msra.mxu0 %v2182_v0  ;;  %2656 = vmatpush.bf16.msra.mxu1 %v2182_v0 }
  0x40   :  { %2657 = vmatpush.bf16.msra.mxu2 %v2182_v0  ;;  %2658 = vmatpush.bf16.msra.mxu3 %v2182_v0 }
  0x42   :  { %232 = vmatmul.bf16.vlgmr.msra.gmra.mxu0 %v2524_v1  ;;  %242 = vmatmul.bf16.vlgmr.msra.gmra.mxu1 %v2526_v2 }
  0x43   :  { %252 = vmatmul.bf16.vlgmr.msra.gmra.mxu2 %v2528_v3  ;;  %262 = vmatmul.bf16.vlgmr.msra.gmra.mxu3 %v2530_v4 }
  0x52   :  { %237 = vmatmul.bf16.gmra.mxu0 %v2525_v5  ;;  %247 = vmatmul.bf16.gmra.mxu1 %v2527_v6 }
  0x53   :  { %257 = vmatmul.bf16.gmra.mxu2 %v2529_v7  ;;  %267 = vmatmul.bf16.gmra.mxu3 %v2531_v43 }
  0xbf   :  { %v2989_v42 = vpop.f32.mrf.mxu0  ;;  %v2991_v44 = vpop.f32.mrf.mxu1 }
  0xc0   :  { %3984 = vst [vmem:[#allocation26_spill] sm:$0xff] %v2989_v42  ;;  %v289_v45 = vmax.f32 %v2989_v42, 1.0  ;;  %v293_v46 = vmax.f32 %v2991_v44, 1.0  ;;  %vm277_vm1 = vcmp.gt.f32.partialorder %v2991_v44, 0.0  ;;  %vm273_vm4 = vcmp.gt.f32.partialorder %v2989_v42, 0.0 }
  0xc1   :  { %3985 = vst [vmem:[#allocation27_spill] sm:$0xff] %v2991_v44 }
  0xc2   :  { %2670 = vrcp.f32 %v289_v45  ;;  %v374_v49 = vand.u32 2147483647, %v293_v46  ;;  %v376_v53 = vand.u32 2147483648, %v293_v46  ;;  %vm370_vm0 = vweird.f32 %v293_v46 }
  0xc3   :  { %2672 = vrcp.f32 %v293_v46  ;;  %v314_v57 = vand.u32 2147483647, %v289_v45  ;;  %vm310_vm2 = vweird.f32 %v289_v45  ;;  %v316_v60 = vand.u32 2147483648, %v289_v45 }
  0xc4   :  { %vm3018_vm3 = vcmp.eq.f32.partialorder %v374_v49, 8.507059e+37  ;;  %v377_v0 = vor.u32 1.1754944e-38, %v376_v53 }
  0xc5   :  { %vm3025_vm6 = vcmp.eq.f32.partialorder %v314_v57, 8.507059e+37  ;;  %v317_v7 = vor.u32 1.1754944e-38, %v316_v60 }
  0xc6   :  { %v2995_v47 = vpop.f32.mrf.mxu2  ;;  %v2997_v48 = vpop.f32.mrf.mxu3 }
  0xc7   :  { %3986 = vst [vmem:[#allocation28_spill] sm:$0xff] %v2995_v47  ;;  %v3000_v50 = vmax.f32 %v2995_v47, 1.0  ;;  %v3002_v51 = vpop.f32.mrf.mxu0  ;;  %v3004_v52 = vpop.f32.mrf.mxu1  ;;  %v3016_v61 = vmax.f32 %v2997_v48, 1.0 }
  0xc8   :  { %3987 = vst [vmem:[#allocation29_spill] sm:$0xff] %v3002_v51  ;;  %v2671_v54 = vpop.eup %2670  ;;  %v3007_v55 = vmax.f32 %v3002_v51, 1.0  ;;  %v3010_v56 = vmax.f32 %v3004_v52, 1.0  ;;  %vm278_vm14 = vcmp.gt.f32.partialorder %v3004_v52, 0.0 }
  0xc9   :  { %3988 = vst [vmem:[#allocation30_spill] sm:$0xff] %v3004_v52  ;;  %v2673_v58 = vpop.eup %2672  ;;  %2674 = vrcp.f32 %v3000_v50  ;;  %v306_v59 = vmul.f32 %v2671_v54, %v289_v45  ;;  %vm311_vm7 = vweird.f32 %v2671_v54  ;;  %vm430_vm8 = vweird.f32 %v3000_v50 }
  0xca   :  { %2676 = vrcp.f32 %v3007_v55  ;;  %v366_v62 = vmul.f32 %v2673_v58, %v293_v46  ;;  %v391_v2 = vand.u32 2147483648, %v3010_v56  ;;  %vm371_vm5 = vweird.f32 %v2673_v58  ;;  %vm312_vm11 = vmor %vm310_vm2, %vm311_vm7 }
  0xcb   :  { %2678 = vrcp.f32 %v3010_v56  ;;  %v307_v1 = vsub.f32 1.0, %v306_v59  ;;  %v389_v5 = vand.u32 2147483647, %v3010_v56  ;;  %vm385_vm9 = vweird.f32 %v3010_v56  ;;  %vm3049_vm10 = vmor %vm370_vm0, %vm371_vm5 }
  0xcc   :  { %v367_v3 = vsub.f32 1.0, %v366_v62  ;;  %2680 = vrcp.f32 %v3016_v61  ;;  %v329_v53 = vand.u32 2147483647, %v3007_v55  ;;  %v3053_v40 = vor.u32 1.1754944e-38, %v391_v2 }
  0xcd   :  { %v308_v6 = vmul.f32 %v2671_v54, %v307_v1  ;;  %v331_v25 = vand.u32 2147483648, %v3007_v55  ;;  %vm3066_vm12 = vcmp.eq.f32.partialorder %v389_v5, 8.507059e+37  ;;  %vm325_vm13 = vweird.f32 %v3007_v55 }
  0xce   :  { %v3031_v43 = vpop.f32.mrf.mxu2  ;;  %v368_v41 = vmul.f32 %v2673_v58, %v367_v3  ;;  %v3034_v49 = vpop.f32.mrf.mxu3  ;;  %v434_v2 = vand.u32 2147483647, %v3000_v50  ;;  %vm3086_vm15 = vcmp.eq.f32.partialorder %v329_v53, 8.507059e+37  ;;  %vm274_vm0 = vcmp.gt.f32.partialorder %v3002_v51, 0.0 }
  0xcf   :  { %v3038_v57 = vpop.eup %2674  ;;  %v3041_v59 = vmax.f32 %v3031_v43, 1.0  ;;  %v3043_v62 = vpop.f32.mrf.mxu0  ;;  %v309_v3 = vadd.f32 %v2671_v54, %v308_v6  ;;  %v3064_v46 = vmax.f32 %v3034_v49, 1.0  ;;  %vm281_vm2 = vcmp.gt.f32.partialorder %v2995_v47, 0.0 }
  0xd0   :  { %v3045_v60 = vpop.f32.mrf.mxu1  ;;  %v3056_v24 = vpop.eup %2676  ;;  %v369_v26 = vadd.f32 %v2673_v58, %v368_v41  ;;  %v3073_v8 = vmax.f32 %v3043_v62, 1.0  ;;  %v426_v5 = vmul.f32 %v3038_v57, %v3000_v50 }
  0xd1   :  { %v3059_v27 = vmax.f32 %v3045_v60, 1.0  ;;  %v2679_v6 = vpop.eup %2678  ;;  %v313_v29 = vsel %vm312_vm11, %v2671_v54, %v309_v3  ;;  %v321_v45 = vmul.f32 %v3056_v24, %v3007_v55  ;;  %2682 = vrcp.f32 %v3041_v59 }
  0xd2   :  { %v373_v41 = vsel %vm3049_vm10, %v2673_v58, %v369_v26  ;;  %v318_v28 = vsel %vm3025_vm6, %v317_v7, %v313_v29  ;;  %v381_v11 = vmul.f32 %v2679_v6, %v3010_v56  ;;  %v436_v26 = vand.u32 2147483648, %v3000_v50  ;;  %v3100_v29 = vpop.eup %2680 }
  0xd3   :  { %2684 = vrcp.f32 %v3059_v27  ;;  %v378_v3 = vsel %vm3018_vm3, %v377_v0, %v373_v41  ;;  %v3095_v10 = vsel %vm273_vm4, %v318_v28, 0.0  ;;  %vm386_vm3 = vweird.f32 %v2679_v6 }
  0xd4   :  { %v3104_v58 = vsel %vm277_vm1, %v378_v3, 0.0  ;;  %643 = vperm.xlu0 %2662, %v3095_v10   ;;  %v382_v63 = vsub.f32 1.0, %v381_v11  ;;  %v322_v0 = vsub.f32 1.0, %v321_v45  ;;  %2686 = vrcp.f32 %v3073_v8  ;;  %vm3125_vm5 = vmor %vm385_vm9, %vm386_vm3 }
  0xd5   :  { %659 = vperm.xlu2 %2664, %v3104_v58   ;;  %v332_v28 = vor.u32 1.1754944e-38, %v331_v25  ;;  %v427_v4 = vsub.f32 1.0, %v426_v5  ;;  %vm431_vm4 = vweird.f32 %v3038_v57  ;;  %2688 = vrcp.f32 %v3064_v46 }
  0xd6   :  { %v3110_v7 = vpop.f32.mrf.mxu2  ;;  %v383_v53 = vmul.f32 %v2679_v6, %v382_v63  ;;  %v323_v1 = vmul.f32 %v3056_v24, %v322_v0  ;;  %vm326_vm1 = vweird.f32 %v3056_v24  ;;  %v3115_v11 = vpop.f32.mrf.mxu3  ;;  %vm3132_vm6 = vcmp.eq.f32.partialorder %v434_v2, 8.507059e+37  ;;  %vm3146_vm7 = vmor %vm430_vm8, %vm431_vm4 }
  0xd7   :  { %v3118_v45 = vmax.f32 %v3110_v7, 1.0  ;;  %v3120_v41 = vpop.f32.mrf.mxu0  ;;  %v428_v3 = vmul.f32 %v3038_v57, %v427_v4  ;;  %v437_v0 = vor.u32 1.1754944e-38, %v436_v26  ;;  %v3136_v44 = vpop.eup %2682  ;;  %vm400_vm9 = vweird.f32 %v3059_v27  ;;  %vm327_vm10 = vmor %vm325_vm13, %vm326_vm1 }
  0xd8   :  { %v3129_v5 = vpop.f32.mrf.mxu1  ;;  %v3139_v42 = vmax.f32 %v3120_v41, 1.0  ;;  %v384_v31 = vadd.f32 %v2679_v6, %v383_v53  ;;  %v324_v56 = vadd.f32 %v3056_v24, %v323_v1  ;;  %v3159_v4 = vmax.f32 %v3115_v11, 1.0 }
  0xd9   :  { %v2685_v2 = vpop.eup %2684  ;;  %v3156_v26 = vmax.f32 %v3129_v5, 1.0  ;;  %v429_v50 = vadd.f32 %v3038_v57, %v428_v3  ;;  %v404_v53 = vand.u32 2147483647, %v3059_v27  ;;  %vm279_vm8 = vcmp.gt.f32.partialorder %v3045_v60, 0.0 }
  0xda   :  { %v388_v1 = vsel %vm3125_vm5, %v2679_v6, %v384_v31  ;;  %v328_v13 = vsel %vm327_vm10, %v3056_v24, %v324_v56  ;;  %v396_v55 = vmul.f32 %v2685_v2, %v3059_v27  ;;  %v406_v12 = vand.u32 2147483648, %v3059_v27  ;;  %v3169_v33 = vpop.eup %2686 }
  0xdb   :  { %2690 = vrcp.f32 %v3118_v45  ;;  %v393_v3 = vsel %vm3066_vm12, %v3053_v40, %v388_v1  ;;  %v333_v25 = vsel %vm3086_vm15, %v332_v28, %v328_v13  ;;  %v433_v24 = vsel %vm3146_vm7, %v3038_v57, %v429_v50  ;;  %v3180_v31 = vpop.eup %2688 }
  0xdc   :  { %2692 = vrcp.f32 %v3139_v42  ;;  %v3185_v6 = vsel %vm278_vm14, %v393_v3, 0.0  ;;  %v3189_v56 = vsel %vm274_vm0, %v333_v25, 0.0  ;;  %v438_v9 = vsel %vm3132_vm6, %v437_v0, %v433_v24 }
  0xdd   :  { %663 = vperm.xlu2 %2664, %v3185_v6   ;;  %647 = vperm.xlu0 %2662, %v3189_v56   ;;  %2694 = vrcp.f32 %v3156_v26  ;;  %v397_v13 = vsub.f32 1.0, %v396_v55  ;;  %vm401_vm11 = vweird.f32 %v2685_v2  ;;  %vm3196_vm12 = vcmp.eq.f32.partialorder %v404_v53, 8.507059e+37 }
  0xde   :  { %v3200_v40 = vpop.f32.mrf.mxu2  ;;  %2696 = vrcp.f32 %v3159_v4  ;;  %v3205_v57 = vsel %vm281_vm2, %v438_v9, 0.0  ;;  %v407_v54 = vor.u32 1.1754944e-38, %v406_v12  ;;  %v336_v28 = vmul.f32 %v3169_v33, %v3073_v8  ;;  %v3209_v63 = vpop.f32.mrf.mxu3  ;;  %vm3219_vm15 = vmor %vm400_vm9, %vm401_vm11 }
  0xdf   :  { %4007 = vst [vmem:[#allocation31_spill] sm:$0xff] %v3205_v57  ;;  %v3212_v0 = vmax.f32 %v3200_v40, 1.0  ;;  %v398_v50 = vmul.f32 %v2685_v2, %v397_v13  ;;  %vm275_vm13 = vcmp.gt.f32.partialorder %v3043_v62, 0.0  ;;  %vm340_vm14 = vweird.f32 %v3073_v8 }
  0xe0   :  { %v344_v53 = vand.u32 2147483647, %v3073_v8  ;;  %v337_v12 = vsub.f32 1.0, %v336_v28  ;;  %vm341_vm0 = vweird.f32 %v3169_v33  ;;  %v346_v55 = vand.u32 2147483648, %v3073_v8 }
  0xe1   :  { %v441_v3 = vmul.f32 %v3136_v44, %v3041_v59  ;;  %v3227_v25 = vpop.eup %2690  ;;  %2698 = vrcp.f32 %v3212_v0  ;;  %v399_v24 = vadd.f32 %v2685_v2, %v398_v50  ;;  %v3231_v9 = vmax.f32 %v3209_v63, 1.0  ;;  %vm3258_vm5 = vmor %vm340_vm14, %vm341_vm0 }
  0xe2   :  { %vm282_vm2 = vcmp.gt.f32.partialorder %v3031_v43, 0.0  ;;  %v3234_v27 = vpop.eup %2692  ;;  %v338_v13 = vmul.f32 %v3169_v33, %v337_v12  ;;  %vm3237_vm3 = vcmp.eq.f32.partialorder %v344_v53, 8.507059e+37  ;;  %vm445_vm4 = vweird.f32 %v3041_v59 }
  0xe3   :  { %v442_v47 = vsub.f32 1.0, %v441_v3  ;;  %v3242_v52 = vpop.eup %2694  ;;  %v403_v50 = vsel %vm3219_vm15, %v2685_v2, %v399_v24  ;;  %vm446_vm1 = vweird.f32 %v3136_v44  ;;  %v449_v51 = vand.u32 2147483647, %v3041_v59 }
  0xe4   :  { %v451_v32 = vand.u32 2147483648, %v3041_v59  ;;  %v3249_v15 = vpop.eup %2696  ;;  %v408_v53 = vsel %vm3196_vm12, %v407_v54, %v403_v50  ;;  %v339_v12 = vadd.f32 %v3169_v33, %v338_v13  ;;  %v347_v2 = vor.u32 1.1754944e-38, %v346_v55  ;;  %vm3271_vm6 = vmor %vm445_vm4, %vm446_vm1 }
  0xe5   :  { %v443_v3 = vmul.f32 %v3136_v44, %v442_v47  ;;  %675 = vperm.xlu2 %2664, %v3205_v57   ;;  %v3266_v24 = vsel %vm279_vm8, %v408_v53, 0.0  ;;  %2700 = vrcp.f32 %v3231_v9  ;;  %v351_v54 = vmul.f32 %v3234_v27, %v3139_v42 }
  0xe6   :  { %v452_v8 = vor.u32 1.1754944e-38, %v451_v32  ;;  %667 = vperm.xlu0 %2662, %v3266_v24   ;;  %v343_v47 = vsel %vm3258_vm5, %v3169_v33, %v339_v12  ;;  %vm450_vm7 = vcmp.eq.f32.partialorder %v449_v51, 8.507059e+37  ;;  %vm276_vm9 = vcmp.gt.f32.partialorder %v3120_v41, 0.0 }
  0xe7   :  { %v444_v55 = vadd.f32 %v3136_v44, %v443_v3  ;;  %v2699_v59 = vpop.eup %2698  ;;  %v348_v13 = vsel %vm3237_vm3, %v347_v2, %v343_v47  ;;  %v352_v50 = vsub.f32 1.0, %v351_v54  ;;  %v359_v32 = vand.u32 2147483647, %v3139_v42 }
  0xe8   :  { %v361_v53 = vand.u32 2147483648, %v3139_v42  ;;  %v3289_v57 = vsel %vm275_vm13, %v348_v13, 0.0  ;;  %vm355_vm10 = vweird.f32 %v3139_v42  ;;  %v471_v51 = vmul.f32 %v2699_v59, %v3212_v0 }
  0xe9   :  { %v448_v33 = vsel %vm3271_vm6, %v3136_v44, %v444_v55  ;;  %651 = vperm.xlu1 %2663, %v3289_v57   ;;  %v353_v12 = vmul.f32 %v3234_v27, %v352_v50  ;;  %vm356_vm8 = vweird.f32 %v3234_v27  ;;  %vm3299_vm11 = vcmp.eq.f32.partialorder %v359_v32, 8.507059e+37 }
  0xea   :  { %v453_v28 = vsel %vm450_vm7, %v452_v8, %v448_v33  ;;  %v362_v2 = vor.u32 1.1754944e-38, %v361_v53  ;;  %v472_v3 = vsub.f32 1.0, %v471_v51  ;;  %vm475_vm12 = vweird.f32 %v3212_v0  ;;  %vm357_vm14 = vmor %vm355_vm10, %vm356_vm8 }
  0xeb   :  { %vm476_vm13 = vweird.f32 %v2699_v59  ;;  %v3304_v44 = vpop.eup %2700  ;;  %v3308_v30 = vsel %vm282_vm2, %v453_v28, 0.0  ;;  %v354_v8 = vadd.f32 %v3234_v27, %v353_v12  ;;  %v479_v54 = vand.u32 2147483647, %v3212_v0 }
  0xec   :  { %v481_v47 = vand.u32 2147483648, %v3212_v0  ;;  %v473_v55 = vmul.f32 %v2699_v59, %v472_v3  ;;  %v486_v13 = vmul.f32 %v3100_v29, %v3016_v61  ;;  %vm490_vm15 = vweird.f32 %v3016_v61  ;;  %vm3320_vm2 = vmor %vm475_vm12, %vm476_vm13 }
  0xed   :  { %vm491_vm0 = vweird.f32 %v3100_v29  ;;  %v358_v50 = vsel %vm357_vm14, %v3234_v27, %v354_v8  ;;  %vm3324_vm3 = vcmp.eq.f32.partialorder %v479_v54, 8.507059e+37  ;;  %v494_v0 = vand.u32 2147483647, %v3016_v61 }
  0xee   :  { %v482_v42 = vor.u32 1.1754944e-38, %v481_v47  ;;  %679 = vperm.xlu0 %2662, %v3308_v30   ;;  %v363_v33 = vsel %vm3299_vm11, %v362_v2, %v358_v50  ;;  %v474_v51 = vadd.f32 %v2699_v59, %v473_v55  ;;  %v487_v28 = vsub.f32 1.0, %v486_v13  ;;  %vm3352_vm6 = vmor %vm490_vm15, %vm491_vm0 }
  0xef   :  { %v496_v27 = vand.u32 2147483648, %v3016_v61  ;;  %v3335_v12 = vsel %vm276_vm9, %v363_v33, 0.0  ;;  %vm284_vm4 = vcmp.gt.f32.partialorder %v3200_v40, 0.0  ;;  %vm285_vm1 = vcmp.gt.f32.partialorder %v2997_v48, 0.0 }
  0xf0   :  { %v411_v3 = vmul.f32 %v3242_v52, %v3156_v26  ;;  %v478_v8 = vsel %vm3320_vm2, %v2699_v59, %v474_v51  ;;  %v488_v1 = vmul.f32 %v3100_v29, %v487_v28  ;;  %vm415_vm5 = vweird.f32 %v3156_v26 }
  0xf1   :  { %v497_v2 = vor.u32 1.1754944e-38, %v496_v27  ;;  %655 = vperm.xlu1 %2663, %v3335_v12   ;;  %v483_v54 = vsel %vm3324_vm3, %v482_v42, %v478_v8  ;;  %vm416_vm7 = vweird.f32 %v3242_v52  ;;  %v419_v59 = vand.u32 2147483647, %v3156_v26 }
  0xf2   :  { %v412_v55 = vsub.f32 1.0, %v411_v3  ;;  %v3358_v13 = vsel %vm284_vm4, %v483_v54, 0.0  ;;  %v489_v50 = vadd.f32 %v3100_v29, %v488_v1  ;;  %vm495_vm9 = vcmp.eq.f32.partialorder %v494_v0, 8.507059e+37  ;;  %vm3376_vm11 = vmor %vm415_vm5, %vm416_vm7 }
  0xf3   :  { %v421_v32 = vand.u32 2147483648, %v3156_v26  ;;  %687 = vperm.xlu2 %2664, %v3358_v13   ;;  %vm3364_vm10 = vcmp.eq.f32.partialorder %v419_v59, 8.507059e+37  ;;  %v516_v42 = vmul.f32 %v3249_v15, %v3159_v4  ;;  %vm520_vm8 = vweird.f32 %v3159_v4 }
  0xf4   :  { %v413_v61 = vmul.f32 %v3242_v52, %v412_v55  ;;  %v493_v33 = vsel %vm3352_vm6, %v3100_v29, %v489_v50  ;;  %vm521_vm12 = vweird.f32 %v3249_v15  ;;  %v524_v28 = vand.u32 2147483647, %v3159_v4 }
  0xf5   :  { %v422_v51 = vor.u32 1.1754944e-38, %v421_v32  ;;  %v498_v27 = vsel %vm495_vm9, %v497_v2, %v493_v33  ;;  %v517_v8 = vsub.f32 1.0, %v516_v42  ;;  %v526_v1 = vand.u32 2147483648, %v3159_v4  ;;  %vm3404_vm0 = vmor %vm520_vm8, %vm521_vm12 }
  0xf6   :  { %v414_v3 = vadd.f32 %v3242_v52, %v413_v61  ;;  %v3386_v29 = vsel %vm285_vm1, %v498_v27, 0.0  ;;  %vm280_vm13 = vcmp.gt.f32.partialorder %v3129_v5, 0.0  ;;  %vm287_vm14 = vcmp.gt.f32.partialorder %v3115_v11, 0.0 }
  0xf7   :  { %v531_v26 = vmul.f32 %v3304_v44, %v3231_v9  ;;  %691 = vperm.xlu0 %2662, %v3386_v29   ;;  %v518_v54 = vmul.f32 %v3249_v15, %v517_v8  ;;  %v527_v47 = vor.u32 1.1754944e-38, %v526_v1  ;;  %vm535_vm15 = vweird.f32 %v3231_v9 }
  0xf8   :  { %v418_v2 = vsel %vm3376_vm11, %v3242_v52, %v414_v3  ;;  %vm536_vm2 = vweird.f32 %v3304_v44  ;;  %v539_v52 = vand.u32 2147483647, %v3231_v9  ;;  %vm525_vm3 = vcmp.eq.f32.partialorder %v524_v28, 8.507059e+37 }
  0xf9   :  { %v423_v55 = vsel %vm3364_vm10, %v422_v51, %v418_v2  ;;  %v532_v50 = vsub.f32 1.0, %v531_v26  ;;  %v519_v61 = vadd.f32 %v3249_v15, %v518_v54  ;;  %v541_v53 = vand.u32 2147483648, %v3231_v9  ;;  %vm3428_vm5 = vmor %vm535_vm15, %vm536_vm2 }
  0xfa   :  { %v3410_v32 = vsel %vm280_vm13, %v423_v55, 0.0  ;;  %vm3416_vm4 = vcmp.eq.f32.partialorder %v539_v52, 8.507059e+37  ;;  %v456_v33 = vmul.f32 %v3227_v25, %v3118_v45  ;;  %vm460_vm1 = vweird.f32 %v3118_v45 }
  0xfb   :  { %671 = vperm.xlu1 %2663, %v3410_v32   ;;  %v533_v4 = vmul.f32 %v3304_v44, %v532_v50  ;;  %v523_v0 = vsel %vm3404_vm0, %v3249_v15, %v519_v61  ;;  %v542_v28 = vor.u32 1.1754944e-38, %v541_v53  ;;  %vm461_vm6 = vweird.f32 %v3227_v25 }
  0xfc   :  { %v464_v27 = vand.u32 2147483647, %v3118_v45  ;;  %v528_v3 = vsel %vm525_vm3, %v527_v47, %v523_v0  ;;  %v457_v1 = vsub.f32 1.0, %v456_v33  ;;  %v466_v26 = vand.u32 2147483648, %v3118_v45  ;;  %vm462_vm10 = vmor %vm460_vm1, %vm461_vm6  ;;  %v2532_v47 = vld [vmem:[%s3952_s1] sm:$0xff] }
  0xfd   :  { %v534_v8 = vadd.f32 %v3304_v44, %v533_v4  ;;  %v3438_v15 = vsel %vm287_vm14, %v528_v3, 0.0  ;;  %vm288_vm7 = vcmp.gt.f32.partialorder %v3209_v63, 0.0  ;;  %v501_v9 = vmul.f32 %v3180_v31, %v3064_v46 }
  0xfe   :  { %699 = vperm.xlu2 %2664, %v3438_v15   ;;  %v458_v54 = vmul.f32 %v3227_v25, %v457_v1  ;;  %vm3448_vm9 = vcmp.eq.f32.partialorder %v464_v27, 8.507059e+37  ;;  %v467_v55 = vor.u32 1.1754944e-38, %v466_v26  ;;  %vm505_vm8 = vweird.f32 %v3064_v46  ;;  %v4046_v27 = vld [vmem:[#allocation20_spill] sm:$0xff]  ;;  %v4048_v1 = vld [vmem:[#allocation9_spill] sm:$0xff] }
  0xff   :  { %v538_v2 = vsel %vm3428_vm5, %v3304_v44, %v534_v8  ;;  %v502_v50 = vsub.f32 1.0, %v501_v9  ;;  %vm506_vm11 = vweird.f32 %v3180_v31  ;;  %v509_v61 = vand.u32 2147483647, %v3064_v46  ;;  %v4047_v8 = vld [vmem:[#allocation8_spill] sm:$0xff]  ;;  %v4049_v9 = vld [vmem:[#allocation17_spill] sm:$0xff] }
 0x100   :  { %v543_v59 = vsel %vm3416_vm4, %v542_v28, %v538_v2  ;;  %v459_v52 = vadd.f32 %v3227_v25, %v458_v54  ;;  %v511_v53 = vand.u32 2147483648, %v3064_v46  ;;  %vm283_vm12 = vcmp.gt.f32.partialorder %v3110_v7, 0.0  ;;  %vm507_vm13 = vmor %vm505_vm8, %vm506_vm11  ;;  %v4050_v2 = vld [vmem:[#allocation18_spill] sm:$0xff] }
 0x101   :  { %v3460_v44 = vsel %vm288_vm7, %v543_v59, 0.0  ;;  %v503_v45 = vmul.f32 %v3180_v31, %v502_v50  ;;  %vm510_vm14 = vcmp.eq.f32.partialorder %v509_v61, 8.507059e+37  ;;  %vm286_vm15 = vcmp.gt.f32.partialorder %v3034_v49, 0.0  ;;  %v4052_v59 = vld [vmem:[#allocation16_spill] sm:$0xff] }
 0x102   :  { %703 = vperm.xlu0 %2662, %v3460_v44   ;;  %v463_v4 = vsel %vm462_vm10, %v3227_v25, %v459_v52  ;;  %v512_v0 = vor.u32 1.1754944e-38, %v511_v53  ;;  %v2246_v26 = vor.u32 %v4048_v1, %v4047_v8  ;;  %v2282_v54 = vor.u32 %v4050_v2, %v4049_v9  ;;  %v4055_v8 = vld [vmem:[#allocation30_spill] sm:$0xff] }
 0x103   :  { %v468_v42 = vsel %vm3448_vm9, %v467_v55, %v463_v4  ;;  %v504_v33 = vadd.f32 %v3180_v31, %v503_v45  ;;  %v4051_v55 = vld [vmem:[#allocation15_spill] sm:$0xff]  ;;  %v2533_v45 = vld [vmem:[%s3952_s1 + $0x8] sm:$0xff]  ;;  %v2706_v4 = vmov 0   ;;  %vm625_vm0 = vcmask 7168  }
 0x104   :  { %v3472_v51 = vsel %vm283_vm12, %v468_v42, 0.0  ;;  %v2278_v50 = vor.u32 %v4052_v59, %v4051_v55  ;;  %v4053_v42 = vld [vmem:[#allocation26_spill] sm:$0xff] }
 0x105   :  { %683 = vperm.xlu1 %2663, %v3472_v51   ;;  %v508_v46 = vsel %vm507_vm13, %v3180_v31, %v504_v33  ;;  %v2274_v31 = vor.u32 %v2854_v23, %v2849_v22  ;;  %v2266_v22 = vor.u32 %v2834_v19, %v2829_v18  ;;  %v2262_v23 = vor.u32 %v2824_v17, %v2819_v16  ;;  %v4039_v18 = vld [vmem:[#allocation12_spill] sm:$0xff]  ;;  %v4040_v19 = vld [vmem:[#allocation13_spill] sm:$0xff]  ;;  %v4043_v16 = vld [vmem:[#allocation10_spill] sm:$0xff] }
 0x106   :  { %579 = vrot.lane.b32.xlu2 %v3189_v56, %s2705_s2  ;;  %v513_v25 = vsel %vm510_vm14, %v512_v0, %v508_v46  ;;  %v2270_v56 = vor.u32 %v2844_v21, %v2839_v20  ;;  %v2298_v20 = vor.u32 %v2914_v35, %v2909_v34  ;;  %v4036_v21 = vld [vmem:[#allocation14_spill] sm:$0xff]  ;;  %v4044_v17 = vld [vmem:[#allocation11_spill] sm:$0xff] }
 0x107   :  { %v3481_v28 = vsel %vm286_vm15, %v513_v25, 0.0  ;;  %949 = vmatpush.bf16.msrb.mxu1 %v2274_v31  ;;  %v2250_v34 = vor.u32 %v4044_v17, %v4043_v16  ;;  %v4045_v35 = vld [vmem:[#allocation19_spill] sm:$0xff]  ;;  %2666 = vset.pattern.permute.xlu2 %v2706_v4  ;;  %v4054_v31 = vld [vmem:[#allocation29_spill] sm:$0xff] }
 0x108   :  { %v2286_v3 = vor.u32 %v4046_v27, %v4045_v35 }
 0x10a   :  { %581 = vrot.lane.b32.xlu0 %v3289_v57, %s2705_s2  ;;  %v2306_v57 = vor.u32 %v2934_v39, %v2929_v38  ;;  %v2258_v38 = vor.u32 %v4036_v21, %v2809_v14  ;;  %v4037_v39 = vld [vmem:[#allocation23_spill] sm:$0xff] }
 0x10b   :  { %950 = vmatpush.bf16.msrb.mxu1 %v2270_v56  ;;  %2667 = vset.pattern.permute.xlu0 %v2706_v4 }
 0x10c   :  { %998 = vmatpush.bf16.msrb.mxu2 %v2306_v57 }
 0x10d   :  { %695 = vperm.xlu1 %2663, %v3481_v28  }
 0x10e   :  { %585 = vrot.lane.b32.xlu2 %v3104_v58, %s2705_s2  ;;  %v4038_v58 = vld [vmem:[#allocation24_spill] sm:$0xff] }
 0x10f   :  { %951 = vmatpush.bf16.msrb.mxu1 %v2266_v22 }
 0x112   :  { %587 = vrot.lane.b32.xlu0 %v3185_v6, %s2705_s2  ;;  %v2294_v6 = vor.u32 %v4038_v58, %v4037_v39  ;;  %v2534_v39 = vld [vmem:[%s3952_s1 + $0x10] sm:$0xff] }
 0x113   :  { %952 = vmatpush.bf16.msrb.mxu1 %v2262_v23 }
 0x115   :  { %577 = vrot.lane.b32.xlu1 %v3095_v10, %s2705_s2  ;;  %v2302_v10 = vor.u32 %v2924_v37, %v2919_v36  ;;  %v2254_v36 = vor.u32 %v4040_v19, %v4039_v18  ;;  %v4041_v37 = vld [vmem:[#allocation21_spill] sm:$0xff] }
 0x116   :  { %2665 = vset.pattern.permute.xlu1 %v2706_v4 }
 0x117   :  { %999 = vmatpush.bf16.msrb.mxu2 %v2302_v10  ;;  %953 = vmatpush.bf16.msrb.mxu1 %v2258_v38 }
 0x11a   :  { %589 = vrot.lane.b32.xlu0 %v3266_v24, %s2705_s2  ;;  %v4042_v24 = vld [vmem:[#allocation22_spill] sm:$0xff] }
 0x11b   :  { %1000 = vmatpush.bf16.msrb.mxu2 %v2298_v20  ;;  %954 = vmatpush.bf16.msrb.mxu1 %v2254_v36 }
 0x11d   :  { %583 = vrot.lane.b32.xlu1 %v3335_v12, %s2705_s2  ;;  %v2290_v12 = vor.u32 %v4042_v24, %v4041_v37 }
 0x11f   :  { %1001 = vmatpush.bf16.msrb.mxu2 %v2294_v6  ;;  %955 = vmatpush.bf16.msrb.mxu1 %v2250_v34 }
 0x123   :  { %1002 = vmatpush.bf16.msrb.mxu2 %v2290_v12  ;;  %956 = vmatpush.bf16.msrb.mxu1 %v2246_v26 }
 0x126   :  { %957 = vmatmul.bf16.vlgmr.msrb.gmra.mxu1 %v2532_v47 }
 0x127   :  { %1003 = vmatpush.bf16.msrb.mxu2 %v2286_v3 }
 0x12b   :  { %1004 = vmatpush.bf16.msrb.mxu2 %v2282_v54 }
 0x12f   :  { %v660_v14 = vpop.permute.xlu2 %659  ;;  %1005 = vmatpush.bf16.msrb.mxu2 %v2278_v50 }
 0x136   :  { %962 = vmatmul.bf16.gmra.mxu1 %v2533_v45 }
 0x137   :  { %v664_v52 = vpop.permute.xlu2 %663 }
 0x138   :  { %v711_v1 = vmul.f32 %v664_v52, %v4055_v8 }
 0x13a   :  { %v727_v2 = vpack.c.bf16 %v711_v1, %v711_v1 }
 0x13c   :  { %v823_v50 = vunpack.c.l.b16 %v727_v2 }
 0x13f   :  { %v3529_v61 = vpop.permute.xlu2 %675 }
 0x146   :  { %v644_v53 = vpop.permute.xlu0 %643  ;;  %967 = vmatmul.bf16.gmra.mxu1 %v2534_v39 }
 0x147   :  { %v706_v33 = vmul.f32 %v644_v53, %v4053_v42 }
 0x149   :  { %v722_v25 = vpack.c.bf16 %v706_v33, %v706_v33 }
 0x14b   :  { %v818_v22 = vunpack.c.l.b16 %v722_v25 }
 0x14d   :  { %v3535_v0 = vpop.permute.xlu2 %687 }
 0x14f   :  { %v648_v46 = vpop.permute.xlu0 %647 }
 0x150   :  { %v707_v56 = vmul.f32 %v648_v46, %v4054_v31 }
 0x152   :  { %v723_v57 = vpack.c.bf16 %v707_v56, %v707_v56 }
 0x154   :  { %v819_v10 = vunpack.c.l.b16 %v723_v57 }
 0x156   :  { %v834_v23 = vpack.c.b16 %v819_v10, %v818_v22 }
 0x158   :  { %v700_v20 = vpop.permute.xlu2 %699  ;;  %v668_v21 = vpop.permute.xlu0 %667  ;;  %1006 = vmatmul.bf16.vlgmr.msrb.gmra.mxu2 %v834_v23 }
 0x159   :  { %v720_v9 = vmul.f32 %v700_v20, %v3115_v11  ;;  %v712_v31 = vmul.f32 %v668_v21, %v3045_v60 }
 0x15b   :  { %v652_v38 = vpop.permute.xlu1 %651  ;;  %v736_v55 = vpack.c.bf16 %v720_v9, %v720_v9  ;;  %v728_v10 = vpack.c.bf16 %v712_v31, %v712_v31 }
 0x15c   :  { %v708_v58 = vmul.f32 %v652_v38, %v3043_v62  ;;  %v2535_v62 = vld [vmem:[%s3952_s1 + $0x18] sm:$0xff] }
 0x15d   :  { %972 = vmatmul.bf16.gmra.mxu1 %v2535_v62  ;;  %v3554_v42 = vunpack.c.l.b16 %v736_v55  ;;  %v824_v38 = vunpack.c.l.b16 %v728_v10  ;;  %v4058_v62 = vld [vmem:[#allocation31_spill] sm:$0xff]  ;;  %v2561_v55 = vld [vmem:[%s3955_s4 + $0x28] sm:$0xff] }
 0x15e   :  { %v724_v36 = vpack.c.bf16 %v708_v58, %v708_v58 }
 0x160   :  { %v580_v6 = vpop.permute.xlu2 %579  ;;  %v680_v18 = vpop.permute.xlu0 %679  ;;  %v820_v12 = vunpack.c.l.b16 %v724_v36 }
 0x161   :  { %627 = vst.msk [vmem:[#allocation4 + $0x8] sm:$0xff] %vm625_vm0, %v580_v6  ;;  %v715_v60 = vmul.f32 %v680_v18, %v3031_v43 }
 0x163   :  { %v656_v19 = vpop.permute.xlu1 %655 }
 0x164   :  { %v709_v37 = vmul.f32 %v656_v19, %v3120_v41  ;;  %v4056_v41 = vld [vmem:[#allocation27_spill] sm:$0xff]  ;;  %v4057_v19 = vld [vmem:[#allocation28_spill] sm:$0xff] }
 0x165   :  { %v710_v26 = vmul.f32 %v660_v14, %v4056_v41  ;;  %v2536_v14 = vld [vmem:[%s3952_s1 + $0x20] sm:$0xff]  ;;  %v714_v36 = vmul.f32 %v3529_v61, %v4057_v19 }
 0x166   :  { %v725_v24 = vpack.c.bf16 %v709_v37, %v709_v37  ;;  %v731_v37 = vpack.c.bf16 %v715_v60, %v715_v60 }
 0x167   :  { %v726_v47 = vpack.c.bf16 %v710_v26, %v710_v26 }
 0x168   :  { %v821_v16 = vunpack.c.l.b16 %v725_v24  ;;  %v586_v17 = vpop.permute.xlu2 %585  ;;  %v1112_v34 = vld [vmem:[#allocation4 + $0x8] sm:$0xff] }
 0x169   :  { %630 = vst.msk [vmem:[#allocation4 + $0x20] sm:$0xff] %vm625_vm0, %v586_v17  ;;  %1328 = vperm.xlu2 %2666, %v1112_v34   ;;  %v3545_v35 = vpop.permute.xlu0 %691  ;;  %v822_v4 = vunpack.c.l.b16 %v726_v47 }
 0x16a   :  { %v835_v27 = vpack.c.b16 %v821_v16, %v820_v12  ;;  %v730_v12 = vpack.c.bf16 %v714_v36, %v714_v36  ;;  %v827_v16 = vunpack.c.l.b16 %v731_v37  ;;  %v718_v26 = vmul.f32 %v3545_v35, %v2997_v48  ;;  %v2560_v48 = vld [vmem:[%s3955_s4 + $0x20] sm:$0xff]  ;;  %v2559_v35 = vld [vmem:[%s3955_s4 + $0x18] sm:$0xff] }
 0x16b   :  { %v836_v52 = vpack.c.b16 %v823_v50, %v822_v4  ;;  %v2557_v50 = vld [vmem:[%s3955_s4 + $0x8] sm:$0xff] }
 0x16c   :  { %1011 = vmatmul.bf16.gmra.mxu2 %v835_v27  ;;  %v826_v34 = vunpack.c.l.b16 %v730_v12  ;;  %v717_v27 = vmul.f32 %v3535_v0, %v3200_v40  ;;  %v2539_v40 = vld [vmem:[%s3952_s1 + $0x38] sm:$0xff]  ;;  %v734_v9 = vpack.c.bf16 %v718_v26, %v718_v26  ;;  %v4059_v4 = vld [vmem:[#allocation25_spill] sm:$0xff] }
 0x16d   :  { %v672_v3 = vpop.permute.xlu1 %671  ;;  %977 = vmatmul.bf16.gmra.mxu1 %v2536_v14 }
 0x16e   :  { %v838_v43 = vpack.c.b16 %v827_v16, %v826_v34 }
 0x170   :  { %v1115_v1 = vld [vmem:[#allocation4 + $0x20] sm:$0xff] }
 0x174   :  { %v704_v54 = vpop.permute.xlu0 %703 }
 0x175   :  { %v721_v59 = vmul.f32 %v704_v54, %v3209_v63  ;;  %v713_v63 = vmul.f32 %v672_v3, %v3129_v5  ;;  %v2537_v5 = vld [vmem:[%s3952_s1 + $0x28] sm:$0xff]  ;;  %v733_v3 = vpack.c.bf16 %v717_v27, %v717_v27  ;;  %v830_v54 = vunpack.c.l.b16 %v734_v9 }
 0x177   :  { %v737_v53 = vpack.c.bf16 %v721_v59, %v721_v59  ;;  %v684_v45 = vpop.permute.xlu1 %683  ;;  %v729_v56 = vpack.c.bf16 %v713_v63, %v713_v63  ;;  %v829_v41 = vunpack.c.l.b16 %v733_v3 }
 0x178   :  { %v716_v18 = vmul.f32 %v684_v45, %v3110_v7 }
 0x179   :  { %v3556_v33 = vunpack.c.l.b16 %v737_v53  ;;  %v825_v23 = vunpack.c.l.b16 %v729_v56  ;;  %v2556_v53 = vld [vmem:[%s3955_s4] sm:$0xff] }
 0x17b   :  { %v841_v11 = vpack.c.b16 %v3556_v33, %v3554_v42  ;;  %v837_v39 = vpack.c.b16 %v825_v23, %v824_v38  ;;  %v3634_v42 = vperm.slane %v4059_v4, 0 }
 0x17c   :  { %v582_v46 = vpop.permute.xlu0 %581  ;;  %1016 = vmatmul.bf16.gmra.mxu2 %v836_v52 }
 0x17d   :  { %628 = vst.msk [vmem:[#allocation4 + $0x10] sm:$0xff] %vm625_vm0, %v582_v46  ;;  %982 = vmatmul.bf16.gmra.mxu1 %v2537_v5 }
 0x17f   :  { %v696_v25 = vpop.permute.xlu1 %695 }
 0x180   :  { %v719_v0 = vmul.f32 %v696_v25, %v3034_v49 }
 0x184   :  { %v588_v57 = vpop.permute.xlu0 %587  ;;  %v1113_v22 = vld [vmem:[#allocation4 + $0x10] sm:$0xff] }
 0x185   :  { %631 = vst.msk [vmem:[#allocation4 + $0x28] sm:$0xff] %vm625_vm0, %v588_v57  ;;  %1333 = vperm.xlu2 %2666, %v1113_v22  }
 0x187   :  { %v578_v20 = vpop.permute.xlu1 %577 }
 0x188   :  { %626 = vst.msk [vmem:[#allocation4] sm:$0xff] %vm625_vm0, %v578_v20 }
 0x18c   :  { %v590_v58 = vpop.permute.xlu0 %589  ;;  %1021 = vmatmul.bf16.gmra.mxu2 %v837_v39  ;;  %v1116_v24 = vld [vmem:[#allocation4 + $0x28] sm:$0xff] }
 0x18d   :  { %632 = vst.msk [vmem:[#allocation4 + $0x30] sm:$0xff] %vm625_vm0, %v590_v58  ;;  %595 = vrot.lane.b32.xlu2 %v3308_v30, %s2705_s2  ;;  %v2538_v30 = vld [vmem:[%s3952_s1 + $0x30] sm:$0xff] }
 0x18e   :  { %987 = vmatmul.bf16.gmra.mxu1 %v2538_v30 }
 0x18f   :  { %v584_v21 = vpop.permute.xlu1 %583  ;;  %v1111_v6 = vld [vmem:[#allocation4] sm:$0xff] }
 0x190   :  { %629 = vst.msk [vmem:[#allocation4 + $0x18] sm:$0xff] %vm625_vm0, %v584_v21  ;;  %1323 = vperm.xlu1 %2665, %v1111_v6  }
 0x194   :  { %v1117_v61 = vld [vmem:[#allocation4 + $0x30] sm:$0xff] }
 0x195   :  { %1348 = vperm.xlu2 %2666, %v1116_v24  }
 0x197   :  { %v1114_v17 = vld [vmem:[#allocation4 + $0x18] sm:$0xff] }
 0x198   :  { %591 = vrot.lane.b32.xlu1 %v3410_v32, %s2705_s2  ;;  %1338 = vperm.xlu0 %2667, %v1114_v17   ;;  %v732_v32 = vpack.c.bf16 %v716_v18, %v716_v18 }
 0x19a   :  { %v828_v8 = vunpack.c.l.b16 %v732_v32 }
 0x19c   :  { %1026 = vmatmul.bf16.gmra.mxu2 %v838_v43  ;;  %v839_v7 = vpack.c.b16 %v829_v41, %v828_v8 }
 0x19d   :  { %1353 = vperm.xlu2 %2666, %v1117_v61  }
 0x19e   :  { %992 = vmatmul.bf16.gmra.mxu1 %v2539_v40 }
 0x1a0   :  { %593 = vrot.lane.b32.xlu1 %v4058_v62, %s2705_s2  ;;  %597 = vrot.lane.b32.xlu0 %v3472_v51, %s2705_s2  ;;  %v2563_v51 = vld [vmem:[%s3955_s4 + $0x38] sm:$0xff] }
 0x1a1   :  { %1580 = vmatpush.bf16.msrb.mxu0 %v2563_v51 }
 0x1a3   :  { %v958_v47 = vpop.f32.mrf.mxu1 }
 0x1a4   :  { %v959_v14 = vadd.f32 %v958_v47, %v3634_v42 }
 0x1a5   :  { %603 = vrot.lane.b32.xlu2 %v3481_v28, %s2705_s2  ;;  %v2562_v28 = vld [vmem:[%s3955_s4 + $0x30] sm:$0xff] }
 0x1a6   :  { %1581 = vmatpush.bf16.msrb.mxu0 %v2562_v28 }
 0x1a8   :  { %1343 = vperm.xlu1 %2665, %v1115_v1  }
 0x1aa   :  { %1582 = vmatpush.bf16.msrb.mxu0 %v2561_v55 }
 0x1ac   :  { %1031 = vmatmul.bf16.gmra.mxu2 %v839_v7 }
 0x1ad   :  { %605 = vrot.lane.b32.xlu2 %v3438_v15, %s2705_s2  ;;  %v735_v15 = vpack.c.bf16 %v719_v0, %v719_v0 }
 0x1ae   :  { %1583 = vmatpush.bf16.msrb.mxu0 %v2560_v48 }
 0x1af   :  { %v831_v2 = vunpack.c.l.b16 %v735_v15 }
 0x1b0   :  { %599 = vrot.lane.b32.xlu1 %v3358_v13, %s2705_s2  ;;  %v960_v13 = vpop.f32.mrf.mxu1 }
 0x1b1   :  { %v840_v49 = vpack.c.b16 %v831_v2, %v830_v54  ;;  %v961_v46 = vadd.f32 %v960_v13, %v3634_v42 }
 0x1b2   :  { %1584 = vmatpush.bf16.msrb.mxu0 %v2559_v35 }
 0x1b8   :  { %601 = vrot.lane.b32.xlu1 %v3386_v29, %s2705_s2  ;;  %v2558_v29 = vld [vmem:[%s3955_s4 + $0x10] sm:$0xff]  ;;  %v963_v59 = vpop.f32.mrf.mxu1 }
 0x1b9   :  { %1585 = vmatpush.bf16.msrb.mxu0 %v2558_v29  ;;  %v964_v60 = vadd.f32 %v963_v59, %v3634_v42 }
 0x1bc   :  { %1036 = vmatmul.bf16.gmra.mxu2 %v840_v49 }
 0x1bd   :  { %1586 = vmatpush.bf16.msrb.mxu0 %v2557_v50 }
 0x1c0   :  { %v965_v52 = vpop.f32.mrf.mxu1 }
 0x1c1   :  { %1587 = vmatpush.bf16.msrb.mxu0 %v2556_v53  ;;  %v966_v21 = vadd.f32 %v965_v52, %v3634_v42 }
 0x1c3   :  { %v3631_v45 = vpop.permute.xlu2 %1328 }
 0x1c8   :  { %v968_v56 = vpop.f32.mrf.mxu1 }
 0x1c9   :  { %v969_v30 = vadd.f32 %v968_v56, %v3634_v42 }
 0x1cc   :  { %1041 = vmatmul.bf16.gmra.mxu2 %v841_v11 }
 0x1d0   :  { %v970_v5 = vpop.f32.mrf.mxu1 }
 0x1d1   :  { %v971_v62 = vadd.f32 %v970_v5, %v3634_v42 }
 0x1da   :  { %v973_v24 = vpop.f32.mrf.mxu1 }
 0x1db   :  { %v1007_v33 = vpop.f32.mrf.mxu2  ;;  %v974_v15 = vadd.f32 %v973_v24, %v3634_v42 }
 0x1dc   :  { %v1008_v63 = vadd.f32 %v1007_v33, %v959_v14 }
 0x1de   :  { %v1047_v57 = vmax.f32 %v1008_v63, 0.0 }
 0x1df   :  { %v3637_v11 = vpop.permute.xlu2 %1333 }
 0x1e2   :  { %v975_v18 = vpop.f32.mrf.mxu1 }
 0x1e3   :  { %v1009_v25 = vpop.f32.mrf.mxu2  ;;  %v976_v47 = vadd.f32 %v975_v18, %v3634_v42 }
 0x1e4   :  { %v1010_v31 = vadd.f32 %v1009_v25, %v961_v46 }
 0x1e6   :  { %v1048_v10 = vmax.f32 %v1010_v31, 0.0 }
 0x1e7   :  { %v596_v22 = vpop.permute.xlu2 %595 }
 0x1e8   :  { %635 = vst.msk [vmem:[#allocation4 + $0x48] sm:$0xff] %vm625_vm0, %v596_v22  ;;  %v2591_v23 = vpack.c.bf16 %v1048_v10, %v1047_v57 }
 0x1ea   :  { %2592 = vst [vmem:[#allocation3] sm:$0xff] %v2591_v23   ;;  %v978_v28 = vpop.f32.mrf.mxu1 }
 0x1eb   :  { %v979_v46 = vadd.f32 %v978_v28, %v3634_v42 }
 0x1ef   :  { %v3641_v20 = vpop.permute.xlu2 %1348  ;;  %v1120_v38 = vld [vmem:[#allocation4 + $0x48] sm:$0xff]  ;;  %v1012_v39 = vpop.f32.mrf.mxu2 }
 0x1f0   :  { %1368 = vperm.xlu1 %2665, %v1120_v38   ;;  %v1013_v6 = vadd.f32 %v1012_v39, %v964_v60 }
 0x1f1   :  { %v3643_v58 = vld [vmem:[#allocation3] sm:$0xff] }
 0x1f2   :  { %1588 = vmatmul.bf16.vlgmr.msrb.gmra.mxu0 %v3643_v58  ;;  %v1049_v12 = vmax.f32 %v1013_v6, 0.0  ;;  %v980_v13 = vpop.f32.mrf.mxu1 }
 0x1f3   :  { %v981_v56 = vadd.f32 %v980_v13, %v3634_v42 }
 0x1f7   :  { %v3648_v19 = vpop.permute.xlu2 %1353  ;;  %v1014_v36 = vpop.f32.mrf.mxu2 }
 0x1f8   :  { %v1015_v37 = vadd.f32 %v1014_v36, %v966_v21 }
 0x1fa   :  { %v1050_v16 = vmax.f32 %v1015_v37, 0.0  ;;  %v983_v14 = vpop.f32.mrf.mxu1 }
 0x1fb   :  { %v984_v6 = vadd.f32 %v983_v14, %v3634_v42 }
 0x1fc   :  { %v2596_v17 = vpack.c.bf16 %v1050_v16, %v1049_v12 }
 0x1fe   :  { %2628 = vst [vmem:[#allocation3 + $0x18] sm:$0xff] %v2596_v17  }
 0x1ff   :  { %v604_v34 = vpop.permute.xlu2 %603  ;;  %v1017_v43 = vpop.f32.mrf.mxu2 }
 0x200   :  { %639 = vst.msk [vmem:[#allocation4 + $0x68] sm:$0xff] %vm625_vm0, %v604_v34  ;;  %v1018_v32 = vadd.f32 %v1017_v43, %v969_v30 }
 0x202   :  { %v3652_v61 = vpop.permute.xlu1 %1323  ;;  %v1051_v41 = vmax.f32 %v1018_v32, 0.0  ;;  %v985_v60 = vpop.f32.mrf.mxu1 }
 0x203   :  { %v986_v16 = vadd.f32 %v985_v60, %v3634_v42  ;;  %v2565_v60 = vld [vmem:[%s3955_s4 + $0x48] sm:$0xff] }
 0x205   :  { %v3654_v27 = vld [vmem:[#allocation3 + $0x18] sm:$0xff] }
 0x206   :  { %1593 = vmatmul.bf16.gmra.mxu0 %v3654_v27 }
 0x207   :  { %v606_v3 = vpop.permute.xlu2 %605  ;;  %v1019_v8 = vpop.f32.mrf.mxu2  ;;  %v1124_v25 = vld [vmem:[#allocation4 + $0x68] sm:$0xff] }
 0x208   :  { %640 = vst.msk [vmem:[#allocation4 + $0x70] sm:$0xff] %vm625_vm0, %v606_v3  ;;  %v1020_v1 = vadd.f32 %v1019_v8, %v971_v62 }
 0x20a   :  { %v3659_v7 = vpop.permute.xlu0 %1338  ;;  %v592_v40 = vpop.permute.xlu1 %591  ;;  %v1052_v51 = vmax.f32 %v1020_v1, 0.0 }
 0x20b   :  { %633 = vst.msk [vmem:[#allocation4 + $0x38] sm:$0xff] %vm625_vm0, %v592_v40  ;;  %v988_v24 = vpop.f32.mrf.mxu1 }
 0x20c   :  { %v2601_v0 = vpack.c.bf16 %v1052_v51, %v1051_v41  ;;  %v989_v8 = vadd.f32 %v988_v24, %v3634_v42 }
 0x20e   :  { %2629 = vst [vmem:[#allocation3 + $0x10] sm:$0xff] %v2601_v0  }
 0x20f   :  { %v1022_v26 = vpop.f32.mrf.mxu2  ;;  %v1125_v36 = vld [vmem:[#allocation4 + $0x70] sm:$0xff] }
 0x210   :  { %v1023_v55 = vadd.f32 %v1022_v26, %v974_v15 }
 0x212   :  { %v598_v9 = vpop.permute.xlu0 %597  ;;  %v594_v2 = vpop.permute.xlu1 %593  ;;  %v1118_v54 = vld [vmem:[#allocation4 + $0x38] sm:$0xff]  ;;  %v1053_v29 = vmax.f32 %v1023_v55, 0.0 }
 0x213   :  { %636 = vst.msk [vmem:[#allocation4 + $0x50] sm:$0xff] %vm625_vm0, %v598_v9  ;;  %1358 = vperm.xlu0 %2667, %v1118_v54   ;;  %v990_v32 = vpop.f32.mrf.mxu1 }
 0x214   :  { %634 = vst.msk [vmem:[#allocation4 + $0x40] sm:$0xff] %vm625_vm0, %v594_v2  ;;  %v991_v41 = vadd.f32 %v990_v32, %v3634_v42 }
 0x215   :  { %v3665_v49 = vld [vmem:[#allocation3 + $0x10] sm:$0xff] }
 0x216   :  { %1598 = vmatmul.bf16.gmra.mxu0 %v3665_v49 }
 0x217   :  { %v1024_v48 = vpop.f32.mrf.mxu2 }
 0x218   :  { %v1025_v35 = vadd.f32 %v1024_v48, %v976_v47 }
 0x21a   :  { %v3669_v59 = vpop.permute.xlu1 %1343  ;;  %v1054_v50 = vmax.f32 %v1025_v35, 0.0  ;;  %v1121_v53 = vld [vmem:[#allocation4 + $0x50] sm:$0xff] }
 0x21b   :  { %1373 = vperm.xlu1 %2665, %v1121_v53   ;;  %v1119_v4 = vld [vmem:[#allocation4 + $0x40] sm:$0xff]  ;;  %v993_v28 = vpop.f32.mrf.mxu1 }
 0x21c   :  { %v2606_v33 = vpack.c.bf16 %v1054_v50, %v1053_v29  ;;  %1363 = vperm.xlu0 %2667, %v1119_v4   ;;  %v994_v54 = vadd.f32 %v993_v28, %v3634_v42 }
 0x21e   :  { %2630 = vst [vmem:[#allocation3 + $0x20] sm:$0xff] %v2606_v33  }
 0x21f   :  { %v1027_v52 = vpop.f32.mrf.mxu2 }
 0x220   :  { %v1028_v57 = vadd.f32 %v1027_v52, %v979_v46  ;;  %v3697_v46 = vld [vmem:[#allocation2] sm:$0xff] }
 0x222   :  { %v600_v63 = vpop.permute.xlu1 %599  ;;  %v1055_v23 = vmax.f32 %v1028_v57, 0.0  ;;  %v2570_v57 = vld [vmem:[%s3955_s4 + $0x70] sm:$0xff] }
 0x223   :  { %637 = vst.msk [vmem:[#allocation4 + $0x58] sm:$0xff] %vm625_vm0, %v600_v63  ;;  %1388 = vperm.xlu1 %2665, %v1124_v25   ;;  %v995_v47 = vpop.f32.mrf.mxu1  ;;  %v3707_v25 = vld [vmem:[#allocation2 + $0x8] sm:$0xff] }
 0x224   :  { %607 = vrot.lane.b32.xlu0 %v3460_v44, %s2705_s2  ;;  %v996_v48 = vadd.f32 %v995_v47, %v3634_v42  ;;  %v3689_v42 = vld [vmem:[#allocation2 + $0x30] sm:$0xff] }
 0x225   :  { %v3675_v31 = vld [vmem:[#allocation3 + $0x20] sm:$0xff] }
 0x226   :  { %1603 = vmatmul.bf16.gmra.mxu0 %v3675_v31 }
 0x227   :  { %v1029_v22 = vpop.f32.mrf.mxu2 }
 0x228   :  { %v1030_v10 = vadd.f32 %v1029_v22, %v981_v56  ;;  %v2571_v56 = vld [vmem:[%s3955_s4 + $0x78] sm:$0xff]  ;;  %v2569_v22 = vld [vmem:[%s3955_s4 + $0x68] sm:$0xff] }
 0x229   :  { %1629 = vmatpush.bf16.msra.mxu1 %v2571_v56 }
 0x22a   :  { %v602_v38 = vpop.permute.xlu1 %601  ;;  %v1056_v39 = vmax.f32 %v1030_v10, 0.0  ;;  %v1122_v5 = vld [vmem:[#allocation4 + $0x58] sm:$0xff]  ;;  %v2568_v10 = vld [vmem:[%s3955_s4 + $0x60] sm:$0xff] }
 0x22b   :  { %638 = vst.msk [vmem:[#allocation4 + $0x60] sm:$0xff] %vm625_vm0, %v602_v38  ;;  %1378 = vperm.xlu2 %2666, %v1122_v5   ;;  %v2567_v38 = vld [vmem:[%s3955_s4 + $0x58] sm:$0xff] }
 0x22c   :  { %v2611_v21 = vpack.c.bf16 %v1056_v39, %v1055_v23  ;;  %v3725_v23 = vld [vmem:[#allocation2 + $0x28] sm:$0xff]  ;;  %v2566_v39 = vld [vmem:[%s3955_s4 + $0x50] sm:$0xff]  ;;  %v3734_v5 = vld [vmem:[#allocation2 + $0x38] sm:$0xff] }
 0x22d   :  { %1630 = vmatpush.bf16.msra.mxu1 %v2570_v57 }
 0x22e   :  { %2631 = vst [vmem:[#allocation3 + $0x28] sm:$0xff] %v2611_v21   ;;  %v2564_v21 = vld [vmem:[%s3955_s4 + $0x40] sm:$0xff] }
 0x22f   :  { %v1032_v44 = vpop.f32.mrf.mxu2 }
 0x230   :  { %v1033_v17 = vadd.f32 %v1032_v44, %v984_v6 }
 0x231   :  { %1631 = vmatpush.bf16.msra.mxu1 %v2569_v22 }
 0x232   :  { %v1123_v37 = vld [vmem:[#allocation4 + $0x60] sm:$0xff]  ;;  %v1057_v30 = vmax.f32 %v1033_v17, 0.0 }
 0x233   :  { %1393 = vperm.xlu2 %2666, %v1125_v36   ;;  %1383 = vperm.xlu0 %2667, %v1123_v37  }
 0x235   :  { %v2552_v12 = vld [vmem:[#allocation3 + $0x28] sm:$0xff]  ;;  %1632 = vmatpush.bf16.msra.mxu1 %v2568_v10 }
 0x236   :  { %1608 = vmatmul.bf16.gmra.mxu0 %v2552_v12 }
 0x237   :  { %v1034_v34 = vpop.f32.mrf.mxu2 }
 0x238   :  { %v1035_v43 = vadd.f32 %v1034_v34, %v986_v16 }
 0x239   :  { %1633 = vmatpush.bf16.msra.mxu1 %v2567_v38 }
 0x23a   :  { %v1058_v18 = vmax.f32 %v1035_v43, 0.0 }
 0x23c   :  { %v2616_v62 = vpack.c.bf16 %v1058_v18, %v1057_v30 }
 0x23d   :  { %1634 = vmatpush.bf16.msra.mxu1 %v2566_v39 }
 0x23e   :  { %2632 = vst [vmem:[#allocation3 + $0x8] sm:$0xff] %v2616_v62  }
 0x23f   :  { %v1037_v3 = vpop.f32.mrf.mxu2 }
 0x240   :  { %v1038_v40 = vadd.f32 %v1037_v3, %v989_v8 }
 0x241   :  { %1635 = vmatpush.bf16.msra.mxu1 %v2565_v60 }
 0x242   :  { %v1059_v26 = vmax.f32 %v1038_v40, 0.0 }
 0x245   :  { %v2553_v1 = vld [vmem:[#allocation3 + $0x8] sm:$0xff]  ;;  %1636 = vmatpush.bf16.msra.mxu1 %v2564_v21 }
 0x246   :  { %1613 = vmatmul.bf16.gmra.mxu0 %v2553_v1 }
 0x247   :  { %v1039_v51 = vpop.f32.mrf.mxu2 }
 0x248   :  { %v1040_v0 = vadd.f32 %v1039_v51, %v991_v41 }
 0x24a   :  { %v1060_v15 = vmax.f32 %v1040_v0, 0.0 }
 0x24c   :  { %v2621_v9 = vpack.c.bf16 %v1060_v15, %v1059_v26 }
 0x24e   :  { %2633 = vst [vmem:[#allocation3 + $0x30] sm:$0xff] %v2621_v9  }
 0x24f   :  { %v1042_v2 = vpop.f32.mrf.mxu2 }
 0x250   :  { %v1043_v13 = vadd.f32 %v1042_v2, %v994_v54 }
 0x252   :  { %v1061_v50 = vmax.f32 %v1043_v13, 0.0 }
 0x255   :  { %v2554_v55 = vld [vmem:[#allocation3 + $0x30] sm:$0xff] }
 0x256   :  { %1618 = vmatmul.bf16.gmra.mxu0 %v2554_v55 }
 0x257   :  { %v1044_v35 = vpop.f32.mrf.mxu2 }
 0x258   :  { %v1045_v29 = vadd.f32 %v1044_v35, %v996_v48 }
 0x25a   :  { %v1062_v53 = vmax.f32 %v1045_v29, 0.0 }
 0x25c   :  { %v2626_v4 = vpack.c.bf16 %v1062_v53, %v1061_v50 }
 0x25e   :  { %2634 = vst [vmem:[#allocation3 + $0x38] sm:$0xff] %v2626_v4  }
 0x265   :  { %v2555_v33 = vld [vmem:[#allocation3 + $0x38] sm:$0xff] }
 0x266   :  { %1272 = vmatpush.bf16.msrb.mxu3 %v2555_v33  ;;  %1623 = vmatmul.bf16.gmra.mxu0 %v2555_v33 }
 0x26a   :  { %1273 = vmatpush.bf16.msrb.mxu3 %v2554_v55 }
 0x26e   :  { %1274 = vmatpush.bf16.msrb.mxu3 %v2553_v1 }
 0x272   :  { %1275 = vmatpush.bf16.msrb.mxu3 %v2552_v12 }
 0x276   :  { %1276 = vmatpush.bf16.msrb.mxu3 %v3675_v31  ;;  %v3710_v31 = vld [vmem:[#allocation2 + $0x20] sm:$0xff] }
 0x27a   :  { %1277 = vmatpush.bf16.msrb.mxu3 %v3665_v49 }
 0x27e   :  { %1278 = vmatpush.bf16.msrb.mxu3 %v3654_v27  ;;  %v3701_v27 = vld [vmem:[#allocation2 + $0x18] sm:$0xff] }
 0x282   :  { %1279 = vmatpush.bf16.msrb.mxu3 %v3643_v58  ;;  %v3704_v58 = vld [vmem:[#allocation2 + $0x10] sm:$0xff] }
 0x285   :  { %v3692_v52 = vpop.permute.xlu0 %1358  ;;  %1280 = vmatmul.bf16.vlgmr.msrb.gmra.mxu3 %v3689_v42 }
 0x28e   :  { %v3695_v14 = vpop.permute.xlu0 %1363 }
 0x295   :  { %1285 = vmatmul.bf16.gmra.mxu3 %v3697_v46 }
 0x296   :  { %v608_v63 = vpop.permute.xlu0 %607 }
 0x297   :  { %641 = vst.msk [vmem:[#allocation4 + $0x78] sm:$0xff] %vm625_vm0, %v608_v63 }
 0x29e   :  { %v1126_v49 = vld [vmem:[#allocation4 + $0x78] sm:$0xff] }
 0x29f   :  { %1398 = vperm.xlu0 %2667, %v1126_v49   ;;  %v3752_v49 = vpop.permute.xlu1 %1368 }
 0x2a5   :  { %1290 = vmatmul.bf16.gmra.mxu3 %v3701_v27 }
 0x2b5   :  { %1295 = vmatmul.bf16.gmra.mxu3 %v3704_v58 }
 0x2c5   :  { %1300 = vmatmul.bf16.gmra.mxu3 %v3707_v25 }
 0x2d5   :  { %1305 = vmatmul.bf16.gmra.mxu3 %v3710_v31 }
 0x2e5   :  { %1310 = vmatmul.bf16.gmra.mxu3 %v3725_v23 }
 0x2f5   :  { %1315 = vmatmul.bf16.gmra.mxu3 %v3734_v5 }
 0x308   :  { %v1281_v44 = vpop.f32.mrf.mxu3 }
 0x309   :  { %v1401_v6 = vmul.f32 %v3652_v61, %v1281_v44  ;;  %v3755_v44 = vpop.permute.xlu1 %1373 }
 0x30b   :  { %v1417_v37 = vpack.c.bf16 %v1401_v6, %v1401_v6 }
 0x30d   :  { %v1449_v16 = vunpack.c.l.b16 %v1417_v37 }
 0x310   :  { %v1283_v36 = vpop.f32.mrf.mxu3 }
 0x311   :  { %v1402_v24 = vmul.f32 %v3631_v45, %v1283_v36  ;;  %v3758_v36 = vpop.permute.xlu2 %1378 }
 0x313   :  { %v1418_v12 = vpack.c.bf16 %v1402_v24, %v1402_v24 }
 0x315   :  { %v1450_v17 = vunpack.c.l.b16 %v1418_v12 }
 0x317   :  { %v1465_v34 = vpack.c.b16 %v1450_v17, %v1449_v16 }
 0x318   :  { %v1286_v43 = vpop.f32.mrf.mxu3 }
 0x319   :  { %1637 = vmatmul.bf16.vlgmr.msra.gmra.mxu1 %v1465_v34  ;;  %v1403_v30 = vmul.f32 %v3637_v11, %v1286_v43 }
 0x31b   :  { %v1419_v62 = vpack.c.bf16 %v1403_v30, %v1403_v30 }
 0x31d   :  { %v1451_v8 = vunpack.c.l.b16 %v1419_v62  ;;  %v2578_v62 = vld [vmem:[%s3957_s6 + $0x30] sm:$0xff] }
 0x320   :  { %v1288_v18 = vpop.f32.mrf.mxu3 }
 0x321   :  { %v1404_v32 = vmul.f32 %v3659_v7, %v1288_v18  ;;  %v2579_v18 = vld [vmem:[%s3957_s6 + $0x38] sm:$0xff] }
 0x322   :  { %2019 = vmatpush.bf16.msra.mxu3 %v2579_v18 }
 0x323   :  { %v1420_v3 = vpack.c.bf16 %v1404_v32, %v1404_v32  ;;  %v3767_v32 = vpop.permute.xlu0 %1383 }
 0x325   :  { %v1452_v1 = vunpack.c.l.b16 %v1420_v3 }
 0x326   :  { %2020 = vmatpush.bf16.msra.mxu3 %v2578_v62 }
 0x327   :  { %v1466_v41 = vpack.c.b16 %v1452_v1, %v1451_v8  ;;  %v2577_v8 = vld [vmem:[%s3957_s6 + $0x28] sm:$0xff]  ;;  %v3773_v1 = vpop.permute.xlu1 %1388 }
 0x328   :  { %v1291_v40 = vpop.f32.mrf.mxu3 }
 0x329   :  { %1642 = vmatmul.bf16.gmra.mxu1 %v1466_v41  ;;  %v1405_v51 = vmul.f32 %v3669_v59, %v1291_v40 }
 0x32a   :  { %2021 = vmatpush.bf16.msra.mxu3 %v2577_v8 }
 0x32b   :  { %v1421_v28 = vpack.c.bf16 %v1405_v51, %v1405_v51 }
 0x32d   :  { %v1453_v9 = vunpack.c.l.b16 %v1421_v28  ;;  %v1589_v28 = vpop.f32.mrf.mxu0 }
 0x330   :  { %v1293_v0 = vpop.f32.mrf.mxu3 }
 0x331   :  { %v1406_v26 = vmul.f32 %v3641_v20, %v1293_v0 }
 0x333   :  { %v1422_v15 = vpack.c.bf16 %v1406_v26, %v1406_v26 }
 0x335   :  { %v1454_v2 = vunpack.c.l.b16 %v1422_v15 }
 0x337   :  { %v1467_v54 = vpack.c.b16 %v1454_v2, %v1453_v9 }
 0x338   :  { %v1296_v47 = vpop.f32.mrf.mxu3 }
 0x339   :  { %1647 = vmatmul.bf16.gmra.mxu1 %v1467_v54  ;;  %v1407_v55 = vmul.f32 %v3648_v19, %v1296_v47  ;;  %v3776_v54 = vpop.permute.xlu2 %1393 }
 0x33b   :  { %v1423_v13 = vpack.c.bf16 %v1407_v55, %v1407_v55  ;;  %v2576_v55 = vld [vmem:[%s3957_s6 + $0x20] sm:$0xff] }
 0x33c   :  { %2022 = vmatpush.bf16.msra.mxu3 %v2576_v55 }
 0x33d   :  { %v1455_v50 = vunpack.c.l.b16 %v1423_v13  ;;  %v2575_v13 = vld [vmem:[%s3957_s6 + $0x18] sm:$0xff] }
 0x340   :  { %v1298_v48 = vpop.f32.mrf.mxu3  ;;  %2023 = vmatpush.bf16.msra.mxu3 %v2575_v13 }
 0x341   :  { %v1408_v35 = vmul.f32 %v3692_v52, %v1298_v48  ;;  %v1591_v48 = vpop.f32.mrf.mxu0 }
 0x343   :  { %v1424_v29 = vpack.c.bf16 %v1408_v35, %v1408_v35  ;;  %v3785_v35 = vpop.permute.xlu0 %1398 }
 0x345   :  { %v1456_v53 = vunpack.c.l.b16 %v1424_v29 }
 0x347   :  { %v1468_v4 = vpack.c.b16 %v1456_v53, %v1455_v50 }
 0x348   :  { %v1301_v33 = vpop.f32.mrf.mxu3 }
 0x349   :  { %1652 = vmatmul.bf16.gmra.mxu1 %v1468_v4  ;;  %v1409_v63 = vmul.f32 %v3695_v14, %v1301_v33 }
 0x34b   :  { %v1425_v57 = vpack.c.bf16 %v1409_v63, %v1409_v63 }
 0x34d   :  { %v1457_v38 = vunpack.c.l.b16 %v1425_v57 }
 0x350   :  { %v1303_v56 = vpop.f32.mrf.mxu3 }
 0x351   :  { %v1410_v22 = vmul.f32 %v3752_v49, %v1303_v56  ;;  %v2574_v56 = vld [vmem:[%s3957_s6 + $0x10] sm:$0xff] }
 0x352   :  { %2024 = vmatpush.bf16.msra.mxu3 %v2574_v56 }
 0x353   :  { %v1426_v10 = vpack.c.bf16 %v1410_v22, %v1410_v22  ;;  %v2573_v22 = vld [vmem:[%s3957_s6 + $0x8] sm:$0xff] }
 0x355   :  { %v1458_v39 = vunpack.c.l.b16 %v1426_v10  ;;  %v1594_v10 = vpop.f32.mrf.mxu0 }
 0x356   :  { %2025 = vmatpush.bf16.msra.mxu3 %v2573_v22 }
 0x357   :  { %v1469_v60 = vpack.c.b16 %v1458_v39, %v1457_v38  ;;  %v2572_v38 = vld [vmem:[%s3957_s6] sm:$0xff] }
 0x358   :  { %v1306_v21 = vpop.f32.mrf.mxu3 }
 0x359   :  { %1657 = vmatmul.bf16.gmra.mxu1 %v1469_v60  ;;  %v1411_v6 = vmul.f32 %v3755_v44, %v1306_v21  ;;  %v3800_v60 = vld [vmem:[%s3956_s5] ss:$0 sm:$0xff] }
 0x35a   :  { %2026 = vmatpush.bf16.msra.mxu3 %v2572_v38 }
 0x35b   :  { %v1427_v24 = vpack.c.bf16 %v1411_v6, %v1411_v6  ;;  %v1590_v6 = vadd.f32 %v3800_v60, %v1589_v28 }
 0x35d   :  { %v1459_v17 = vunpack.c.l.b16 %v1427_v24  ;;  %v1596_v39 = vpop.f32.mrf.mxu0 }
 0x35e   :  { %v1597_v28 = vadd.f32 %v3800_v60, %v1596_v39 }
 0x360   :  { %v1308_v37 = vpop.f32.mrf.mxu3 }
 0x361   :  { %v1412_v12 = vmul.f32 %v3758_v36, %v1308_v37 }
 0x363   :  { %v1428_v16 = vpack.c.bf16 %v1412_v12, %v1412_v12  ;;  %v1592_v12 = vadd.f32 %v3800_v60, %v1591_v48 }
 0x365   :  { %v1460_v34 = vunpack.c.l.b16 %v1428_v16  ;;  %v1599_v24 = vpop.f32.mrf.mxu0 }
 0x367   :  { %v1470_v43 = vpack.c.b16 %v1460_v34, %v1459_v17 }
 0x368   :  { %v1311_v30 = vpop.f32.mrf.mxu3 }
 0x369   :  { %1662 = vmatmul.bf16.gmra.mxu1 %v1470_v43  ;;  %v1413_v3 = vmul.f32 %v3767_v32, %v1311_v30 }
 0x36b   :  { %v1429_v40 = vpack.c.bf16 %v1413_v3, %v1413_v3 }
 0x36d   :  { %v1461_v26 = vunpack.c.l.b16 %v1429_v40  ;;  %v1601_v8 = vpop.f32.mrf.mxu0  ;;  %v1595_v40 = vadd.f32 %v3800_v60, %v1594_v10 }
 0x36e   :  { %v1602_v56 = vadd.f32 %v3800_v60, %v1601_v8 }
 0x370   :  { %v1313_v41 = vpop.f32.mrf.mxu3 }
 0x371   :  { %v1414_v51 = vmul.f32 %v3773_v1, %v1313_v41 }
 0x373   :  { %v1430_v0 = vpack.c.bf16 %v1414_v51, %v1414_v51 }
 0x375   :  { %v1462_v15 = vunpack.c.l.b16 %v1430_v0 }
 0x377   :  { %v1471_v9 = vpack.c.b16 %v1462_v15, %v1461_v26 }
 0x378   :  { %v1316_v2 = vpop.f32.mrf.mxu3 }
 0x379   :  { %1667 = vmatmul.bf16.gmra.mxu1 %v1471_v9  ;;  %v1415_v47 = vmul.f32 %v3776_v54, %v1316_v2  ;;  %v1604_v2 = vpop.f32.mrf.mxu0 }
 0x37b   :  { %v1431_v50 = vpack.c.bf16 %v1415_v47, %v1415_v47 }
 0x37d   :  { %v1463_v33 = vunpack.c.l.b16 %v1431_v50 }
 0x380   :  { %v1318_v29 = vpop.f32.mrf.mxu3 }
 0x381   :  { %v1416_v53 = vmul.f32 %v3785_v35, %v1318_v29 }
 0x383   :  { %v1432_v4 = vpack.c.bf16 %v1416_v53, %v1416_v53  ;;  %v1600_v53 = vadd.f32 %v3800_v60, %v1599_v24  ;;  %v1605_v24 = vadd.f32 %v3800_v60, %v1604_v2 }
 0x385   :  { %v1464_v63 = vunpack.c.l.b16 %v1432_v4 }
 0x387   :  { %v1472_v57 = vpack.c.b16 %v1464_v63, %v1463_v33  ;;  %v1606_v63 = vpop.f32.mrf.mxu0 }
 0x389   :  { %1672 = vmatmul.bf16.gmra.mxu1 %v1472_v57 }
 0x396   :  { %v1638_v21 = vpop.f32.mrf.mxu1 }
 0x397   :  { %v1639_v37 = vadd.f32 %v1638_v21, %v1590_v6  ;;  %v1609_v6 = vpop.f32.mrf.mxu0 }
 0x399   :  { %v1678_v16 = vmax.f32 %v1639_v37, 0.0 }
 0x39b   :  { %v1694_v43 = vpack.c.bf16 %v1678_v16, %v1678_v16 }
 0x39d   :  { %v1759_v62 = vunpack.c.l.b16 %v1694_v43  ;;  %v1607_v43 = vadd.f32 %v3800_v60, %v1606_v63 }
 0x39e   :  { %v1640_v17 = vpop.f32.mrf.mxu1 }
 0x39f   :  { %v1641_v34 = vadd.f32 %v1640_v17, %v1592_v12 }
 0x3a1   :  { %v1679_v30 = vmax.f32 %v1641_v34, 0.0 }
 0x3a3   :  { %v1695_v18 = vpack.c.bf16 %v1679_v30, %v1679_v30 }
 0x3a5   :  { %v1760_v3 = vunpack.c.l.b16 %v1695_v18  ;;  %v1611_v18 = vpop.f32.mrf.mxu0 }
 0x3a6   :  { %v1643_v41 = vpop.f32.mrf.mxu1 }
 0x3a7   :  { %v3805_v51 = vpack.c.b16 %v1760_v3, %v1759_v62  ;;  %v1644_v0 = vadd.f32 %v1643_v41, %v1595_v40 }
 0x3a9   :  { %2027 = vmatmul.bf16.vlgmr.msra.gmra.mxu3 %v3805_v51  ;;  %v1680_v26 = vmax.f32 %v1644_v0, 0.0 }
 0x3ab   :  { %v1696_v47 = vpack.c.bf16 %v1680_v26, %v1680_v26 }
 0x3ad   :  { %v1761_v13 = vunpack.c.l.b16 %v1696_v47  ;;  %v1614_v2 = vpop.f32.mrf.mxu0 }
 0x3ae   :  { %v1645_v15 = vpop.f32.mrf.mxu1 }
 0x3af   :  { %v1646_v9 = vadd.f32 %v1645_v15, %v1597_v28  ;;  %v1610_v15 = vadd.f32 %v3800_v60, %v1609_v6 }
 0x3b1   :  { %v1681_v55 = vmax.f32 %v1646_v9, 0.0 }
 0x3b3   :  { %v1697_v48 = vpack.c.bf16 %v1681_v55, %v1681_v55  ;;  %v1612_v55 = vadd.f32 %v3800_v60, %v1611_v18 }
 0x3b5   :  { %v1762_v29 = vunpack.c.l.b16 %v1697_v48 }
 0x3b6   :  { %v1648_v50 = vpop.f32.mrf.mxu1 }
 0x3b7   :  { %v3810_v4 = vpack.c.b16 %v1762_v29, %v1761_v13  ;;  %v1649_v33 = vadd.f32 %v1648_v50, %v1600_v53 }
 0x3b9   :  { %2032 = vmatmul.bf16.gmra.mxu3 %v3810_v4  ;;  %v1682_v57 = vmax.f32 %v1649_v33, 0.0  ;;  %v1616_v33 = vpop.f32.mrf.mxu0 }
 0x3ba   :  { %v1617_v6 = vadd.f32 %v3800_v60, %v1616_v33 }
 0x3bb   :  { %v1698_v38 = vpack.c.bf16 %v1682_v57, %v1682_v57 }
 0x3bd   :  { %v1763_v37 = vunpack.c.l.b16 %v1698_v38 }
 0x3be   :  { %v1650_v22 = vpop.f32.mrf.mxu1 }
 0x3bf   :  { %v1651_v10 = vadd.f32 %v1650_v22, %v1602_v56 }
 0x3c1   :  { %v1683_v39 = vmax.f32 %v1651_v10, 0.0  ;;  %v1615_v10 = vadd.f32 %v3800_v60, %v1614_v2 }
 0x3c3   :  { %v1699_v21 = vpack.c.bf16 %v1683_v39, %v1683_v39 }
 0x3c5   :  { %v1764_v12 = vunpack.c.l.b16 %v1699_v21  ;;  %v1619_v21 = vpop.f32.mrf.mxu0 }
 0x3c6   :  { %v1653_v16 = vpop.f32.mrf.mxu1 }
 0x3c7   :  { %v3815_v17 = vpack.c.b16 %v1764_v12, %v1763_v37  ;;  %v1654_v34 = vadd.f32 %v1653_v16, %v1605_v24 }
 0x3c9   :  { %2037 = vmatmul.bf16.gmra.mxu3 %v3815_v17  ;;  %v1684_v30 = vmax.f32 %v1654_v34, 0.0 }
 0x3cb   :  { %v1700_v8 = vpack.c.bf16 %v1684_v30, %v1684_v30 }
 0x3cd   :  { %v1765_v0 = vunpack.c.l.b16 %v1700_v8  ;;  %v1620_v8 = vadd.f32 %v3800_v60, %v1619_v21 }
 0x3ce   :  { %v1655_v62 = vpop.f32.mrf.mxu1 }
 0x3cf   :  { %v1656_v3 = vadd.f32 %v1655_v62, %v1607_v43  ;;  %v1621_v62 = vpop.f32.mrf.mxu0 }
 0x3d1   :  { %v1685_v41 = vmax.f32 %v1656_v3, 0.0 }
 0x3d3   :  { %v1701_v40 = vpack.c.bf16 %v1685_v41, %v1685_v41 }
 0x3d5   :  { %v1766_v28 = vunpack.c.l.b16 %v1701_v40 }
 0x3d6   :  { %v1658_v26 = vpop.f32.mrf.mxu1 }
 0x3d7   :  { %v3820_v9 = vpack.c.b16 %v1766_v28, %v1765_v0  ;;  %v1659_v47 = vadd.f32 %v1658_v26, %v1610_v15  ;;  %v1622_v0 = vadd.f32 %v3800_v60, %v1621_v62  ;;  %v1624_v2 = vpop.f32.mrf.mxu0 }
 0x3d9   :  { %2042 = vmatmul.bf16.gmra.mxu3 %v3820_v9  ;;  %v1686_v48 = vmax.f32 %v1659_v47, 0.0 }
 0x3db   :  { %v1702_v50 = vpack.c.bf16 %v1686_v48, %v1686_v48 }
 0x3dd   :  { %v1767_v56 = vunpack.c.l.b16 %v1702_v50 }
 0x3de   :  { %v1660_v13 = vpop.f32.mrf.mxu1 }
 0x3df   :  { %v1661_v29 = vadd.f32 %v1660_v13, %v1612_v55 }
 0x3e1   :  { %v1687_v53 = vmax.f32 %v1661_v29, 0.0 }
 0x3e3   :  { %v1703_v63 = vpack.c.bf16 %v1687_v53, %v1687_v53  ;;  %v1625_v53 = vadd.f32 %v3800_v60, %v1624_v2 }
 0x3e5   :  { %v1768_v57 = vunpack.c.l.b16 %v1703_v63 }
 0x3e6   :  { %v1663_v22 = vpop.f32.mrf.mxu1 }
 0x3e7   :  { %v1779_v38 = vpack.c.b16 %v1768_v57, %v1767_v56  ;;  %v1664_v39 = vadd.f32 %v1663_v22, %v1615_v10  ;;  %v1626_v56 = vpop.f32.mrf.mxu0 }
 0x3e8   :  { %v1627_v57 = vadd.f32 %v3800_v60, %v1626_v56  ;;  %v2587_v60 = vld [vmem:[%s3957_s6 + $0x78] sm:$0xff] }
 0x3e9   :  { %2047 = vmatmul.bf16.gmra.mxu3 %v1779_v38  ;;  %v1688_v37 = vmax.f32 %v1664_v39, 0.0  ;;  %2068 = vmatpush.bf16.msra.mxu0 %v2587_v60 }
 0x3eb   :  { %v1704_v24 = vpack.c.bf16 %v1688_v37, %v1688_v37 }
 0x3ed   :  { %v1769_v30 = vunpack.c.l.b16 %v1704_v24 }
 0x3ee   :  { %v1665_v12 = vpop.f32.mrf.mxu1 }
 0x3ef   :  { %v1666_v16 = vadd.f32 %v1665_v12, %v1617_v6 }
 0x3f1   :  { %v1689_v34 = vmax.f32 %v1666_v16, 0.0 }
 0x3f3   :  { %v1705_v43 = vpack.c.bf16 %v1689_v34, %v1689_v34 }
 0x3f5   :  { %v1770_v18 = vunpack.c.l.b16 %v1705_v43 }
 0x3f6   :  { %v1668_v3 = vpop.f32.mrf.mxu1 }
 0x3f7   :  { %v1780_v41 = vpack.c.b16 %v1770_v18, %v1769_v30  ;;  %v1669_v40 = vadd.f32 %v1668_v3, %v1620_v8 }
 0x3f9   :  { %2052 = vmatmul.bf16.gmra.mxu3 %v1780_v41  ;;  %v1690_v28 = vmax.f32 %v1669_v40, 0.0 }
 0x3fb   :  { %v1706_v47 = vpack.c.bf16 %v1690_v28, %v1690_v28 }
 0x3fd   :  { %v1771_v13 = vunpack.c.l.b16 %v1706_v47 }
 0x3fe   :  { %v1670_v26 = vpop.f32.mrf.mxu1 }
 0x3ff   :  { %v1671_v15 = vadd.f32 %v1670_v26, %v1622_v0 }
 0x401   :  { %v1691_v55 = vmax.f32 %v1671_v15, 0.0 }
 0x403   :  { %v1707_v48 = vpack.c.bf16 %v1691_v55, %v1691_v55 }
 0x405   :  { %v1772_v29 = vunpack.c.l.b16 %v1707_v48 }
 0x406   :  { %v1673_v50 = vpop.f32.mrf.mxu1 }
 0x407   :  { %v1781_v33 = vpack.c.b16 %v1772_v29, %v1771_v13  ;;  %v1674_v63 = vadd.f32 %v1673_v50, %v1625_v53 }
 0x409   :  { %2057 = vmatmul.bf16.gmra.mxu3 %v1781_v33  ;;  %v1692_v22 = vmax.f32 %v1674_v63, 0.0 }
 0x40b   :  { %v1708_v21 = vpack.c.bf16 %v1692_v22, %v1692_v22 }
 0x40d   :  { %v1773_v12 = vunpack.c.l.b16 %v1708_v21 }
 0x40e   :  { %v1675_v10 = vpop.f32.mrf.mxu1 }
 0x40f   :  { %v1676_v39 = vadd.f32 %v1675_v10, %v1627_v57 }
 0x411   :  { %v1693_v6 = vmax.f32 %v1676_v39, 0.0 }
 0x413   :  { %v1709_v37 = vpack.c.bf16 %v1693_v6, %v1693_v6 }
 0x415   :  { %v1774_v16 = vunpack.c.l.b16 %v1709_v37 }
 0x417   :  { %v1782_v24 = vpack.c.b16 %v1774_v16, %v1773_v12 }
 0x419   :  { %1791 = vmatpush.bf16.msra.mxu2 %v1782_v24  ;;  %2062 = vmatmul.bf16.gmra.mxu3 %v1782_v24 }
 0x41d   :  { %1792 = vmatpush.bf16.msra.mxu2 %v1781_v33 }
 0x421   :  { %1793 = vmatpush.bf16.msra.mxu2 %v1780_v41 }
 0x425   :  { %1794 = vmatpush.bf16.msra.mxu2 %v1779_v38 }
 0x429   :  { %1795 = vmatpush.bf16.msra.mxu2 %v3820_v9 }
 0x42d   :  { %1796 = vmatpush.bf16.msra.mxu2 %v3815_v17 }
 0x431   :  { %1797 = vmatpush.bf16.msra.mxu2 %v3810_v4 }
 0x435   :  { %1798 = vmatpush.bf16.msra.mxu2 %v3805_v51  ;;  %v2586_v51 = vld [vmem:[%s3957_s6 + $0x70] sm:$0xff] }
 0x436   :  { %2069 = vmatpush.bf16.msra.mxu0 %v2586_v51 }
 0x438   :  { %1799 = vmatmul.bf16.vlgmr.msra.gmra.mxu2 %v3689_v42  ;;  %v2585_v42 = vld [vmem:[%s3957_s6 + $0x68] sm:$0xff] }
 0x43a   :  { %2070 = vmatpush.bf16.msra.mxu0 %v2585_v42 }
 0x448   :  { %1804 = vmatmul.bf16.gmra.mxu2 %v3697_v46  ;;  %v2584_v46 = vld [vmem:[%s3957_s6 + $0x60] sm:$0xff] }
 0x449   :  { %2071 = vmatpush.bf16.msra.mxu0 %v2584_v46 }
 0x458   :  { %1809 = vmatmul.bf16.gmra.mxu2 %v3701_v27  ;;  %v2583_v27 = vld [vmem:[%s3957_s6 + $0x58] sm:$0xff] }
 0x459   :  { %2072 = vmatpush.bf16.msra.mxu0 %v2583_v27 }
 0x468   :  { %1814 = vmatmul.bf16.gmra.mxu2 %v3704_v58  ;;  %v2582_v58 = vld [vmem:[%s3957_s6 + $0x50] sm:$0xff] }
 0x469   :  { %2073 = vmatpush.bf16.msra.mxu0 %v2582_v58 }
 0x478   :  { %1819 = vmatmul.bf16.gmra.mxu2 %v3707_v25  ;;  %v2581_v25 = vld [vmem:[%s3957_s6 + $0x48] sm:$0xff] }
 0x479   :  { %2074 = vmatpush.bf16.msra.mxu0 %v2581_v25 }
 0x488   :  { %1824 = vmatmul.bf16.gmra.mxu2 %v3710_v31  ;;  %v2580_v31 = vld [vmem:[%s3957_s6 + $0x40] sm:$0xff] }
 0x489   :  { %2075 = vmatpush.bf16.msra.mxu0 %v2580_v31 }
 0x498   :  { %1829 = vmatmul.bf16.gmra.mxu2 %v3725_v23 }
 0x4a8   :  { %1834 = vmatmul.bf16.gmra.mxu2 %v3734_v5 }
 0x4bb   :  { %v1800_v23 = vpop.f32.mrf.mxu2 }
 0x4bc   :  { %v1840_v4 = vmul.f32 %v1800_v23, %v3652_v61 }
 0x4be   :  { %v1856_v9 = vpack.c.bf16 %v1840_v4, %v1840_v4 }
 0x4c0   :  { %v1888_v43 = vunpack.c.l.b16 %v1856_v9 }
 0x4c3   :  { %v1802_v17 = vpop.f32.mrf.mxu2 }
 0x4c4   :  { %v1841_v38 = vmul.f32 %v1802_v17, %v3631_v45  ;;  %v2028_v17 = vpop.f32.mrf.mxu3 }
 0x4c6   :  { %v1857_v34 = vpack.c.bf16 %v1841_v38, %v1841_v38 }
 0x4c8   :  { %v1889_v5 = vunpack.c.l.b16 %v1857_v34 }
 0x4ca   :  { %v1904_v30 = vpack.c.b16 %v1889_v5, %v1888_v43 }
 0x4cb   :  { %v1805_v18 = vpop.f32.mrf.mxu2 }
 0x4cc   :  { %2076 = vmatmul.bf16.vlgmr.msra.gmra.mxu0 %v1904_v30  ;;  %v1842_v62 = vmul.f32 %v1805_v18, %v3637_v11  ;;  %v2030_v43 = vpop.f32.mrf.mxu3 }
 0x4ce   :  { %v1858_v8 = vpack.c.bf16 %v1842_v62, %v1842_v62 }
 0x4d0   :  { %v1890_v0 = vunpack.c.l.b16 %v1858_v8 }
 0x4d3   :  { %v1807_v3 = vpop.f32.mrf.mxu2 }
 0x4d4   :  { %v1843_v41 = vmul.f32 %v1807_v3, %v3659_v7 }
 0x4d6   :  { %v1859_v40 = vpack.c.bf16 %v1843_v41, %v1843_v41  ;;  %v2033_v41 = vpop.f32.mrf.mxu3 }
 0x4d8   :  { %v1891_v28 = vunpack.c.l.b16 %v1859_v40 }
 0x4da   :  { %v1905_v61 = vpack.c.b16 %v1891_v28, %v1890_v0 }
 0x4db   :  { %v1810_v26 = vpop.f32.mrf.mxu2 }
 0x4dc   :  { %2081 = vmatmul.bf16.gmra.mxu0 %v1905_v61  ;;  %v1844_v45 = vmul.f32 %v1810_v26, %v3669_v59 }
 0x4de   :  { %v1860_v2 = vpack.c.bf16 %v1844_v45, %v1844_v45  ;;  %v2035_v40 = vpop.f32.mrf.mxu3 }
 0x4e0   :  { %v1892_v48 = vunpack.c.l.b16 %v1860_v2 }
 0x4e3   :  { %v1812_v15 = vpop.f32.mrf.mxu2 }
 0x4e4   :  { %v1845_v47 = vmul.f32 %v1812_v15, %v3641_v20 }
 0x4e6   :  { %v1861_v55 = vpack.c.bf16 %v1845_v47, %v1845_v47 }
 0x4e8   :  { %v1893_v13 = vunpack.c.l.b16 %v1861_v55 }
 0x4ea   :  { %v1906_v11 = vpack.c.b16 %v1893_v13, %v1892_v48 }
 0x4eb   :  { %v1815_v29 = vpop.f32.mrf.mxu2 }
 0x4ec   :  { %2086 = vmatmul.bf16.gmra.mxu0 %v1906_v11  ;;  %v1846_v7 = vmul.f32 %v1815_v29, %v3648_v19 }
 0x4ee   :  { %v1862_v53 = vpack.c.bf16 %v1846_v7, %v1846_v7 }
 0x4f0   :  { %v1894_v56 = vunpack.c.l.b16 %v1862_v53 }
 0x4f3   :  { %v1817_v50 = vpop.f32.mrf.mxu2 }
 0x4f4   :  { %v1847_v33 = vmul.f32 %v1817_v50, %v3692_v52 }
 0x4f6   :  { %v1863_v63 = vpack.c.bf16 %v1847_v33, %v1847_v33 }
 0x4f8   :  { %v1895_v57 = vunpack.c.l.b16 %v1863_v63 }
 0x4fa   :  { %v1907_v59 = vpack.c.b16 %v1895_v57, %v1894_v56 }
 0x4fb   :  { %v1820_v22 = vpop.f32.mrf.mxu2 }
 0x4fc   :  { %2091 = vmatmul.bf16.gmra.mxu0 %v1907_v59  ;;  %v1848_v20 = vmul.f32 %v1820_v22, %v3695_v14 }
 0x4fe   :  { %v1864_v39 = vpack.c.bf16 %v1848_v20, %v1848_v20 }
 0x500   :  { %v1896_v37 = vunpack.c.l.b16 %v1864_v39 }
 0x503   :  { %v1822_v10 = vpop.f32.mrf.mxu2 }
 0x504   :  { %v1849_v21 = vmul.f32 %v1822_v10, %v3752_v49 }
 0x506   :  { %v1865_v6 = vpack.c.bf16 %v1849_v21, %v1849_v21 }
 0x508   :  { %v1897_v12 = vunpack.c.l.b16 %v1865_v6 }
 0x50a   :  { %v1908_v19 = vpack.c.b16 %v1897_v12, %v1896_v37 }
 0x50b   :  { %v1825_v16 = vpop.f32.mrf.mxu2 }
 0x50c   :  { %2096 = vmatmul.bf16.gmra.mxu0 %v1908_v19  ;;  %v1850_v52 = vmul.f32 %v1825_v16, %v3755_v44 }
 0x50e   :  { %v1866_v60 = vpack.c.bf16 %v1850_v52, %v1850_v52 }
 0x510   :  { %v1898_v46 = vunpack.c.l.b16 %v1866_v60 }
 0x513   :  { %v1827_v24 = vpop.f32.mrf.mxu2 }
 0x514   :  { %v1851_v51 = vmul.f32 %v1827_v24, %v3758_v36 }
 0x516   :  { %v1867_v42 = vpack.c.bf16 %v1851_v51, %v1851_v51 }
 0x518   :  { %v1899_v27 = vunpack.c.l.b16 %v1867_v42 }
 0x51a   :  { %v1909_v14 = vpack.c.b16 %v1899_v27, %v1898_v46 }
 0x51b   :  { %v1830_v58 = vpop.f32.mrf.mxu2 }
 0x51c   :  { %2101 = vmatmul.bf16.gmra.mxu0 %v1909_v14  ;;  %v1852_v49 = vmul.f32 %v1830_v58, %v3767_v32 }
 0x51e   :  { %v1868_v31 = vpack.c.bf16 %v1852_v49, %v1852_v49 }
 0x520   :  { %v1900_v9 = vunpack.c.l.b16 %v1868_v31 }
 0x523   :  { %v1832_v25 = vpop.f32.mrf.mxu2 }
 0x524   :  { %v1853_v23 = vmul.f32 %v1832_v25, %v3773_v1  ;;  %v3885_v1 = vld [vmem:[%s3958_s7] ss:$0 sm:$0xff] }
 0x525   :  { %v2029_v0 = vadd.f32 %v3885_v1, %v2028_v17  ;;  %v2031_v61 = vadd.f32 %v3885_v1, %v2030_v43  ;;  %v2034_v15 = vadd.f32 %v3885_v1, %v2033_v41  ;;  %v2036_v48 = vadd.f32 %v3885_v1, %v2035_v40 }
 0x526   :  { %v1869_v4 = vpack.c.bf16 %v1853_v23, %v1853_v23 }
 0x528   :  { %v1901_v44 = vunpack.c.l.b16 %v1869_v4 }
 0x52a   :  { %v1910_v38 = vpack.c.b16 %v1901_v44, %v1900_v9 }
 0x52b   :  { %v1835_v34 = vpop.f32.mrf.mxu2 }
 0x52c   :  { %2106 = vmatmul.bf16.gmra.mxu0 %v1910_v38  ;;  %v1854_v36 = vmul.f32 %v1835_v34, %v3776_v54 }
 0x52e   :  { %v1870_v30 = vpack.c.bf16 %v1854_v36, %v1854_v36 }
 0x530   :  { %v1902_v32 = vunpack.c.l.b16 %v1870_v30 }
 0x533   :  { %v1837_v5 = vpop.f32.mrf.mxu2 }
 0x534   :  { %v1855_v18 = vmul.f32 %v1837_v5, %v3785_v35  ;;  %v2038_v35 = vpop.f32.mrf.mxu3 }
 0x535   :  { %v2039_v7 = vadd.f32 %v3885_v1, %v2038_v35 }
 0x536   :  { %v1871_v62 = vpack.c.bf16 %v1855_v18, %v1855_v18 }
 0x538   :  { %v1903_v3 = vunpack.c.l.b16 %v1871_v62 }
 0x53a   :  { %v1911_v8 = vpack.c.b16 %v1903_v3, %v1902_v32 }
 0x53c   :  { %2111 = vmatmul.bf16.gmra.mxu0 %v1911_v8  ;;  %v2040_v2 = vpop.f32.mrf.mxu3 }
 0x53d   :  { %v2041_v63 = vadd.f32 %v3885_v1, %v2040_v2 }
 0x544   :  { %v2043_v29 = vpop.f32.mrf.mxu3 }
 0x545   :  { %v2044_v22 = vadd.f32 %v3885_v1, %v2043_v29 }
 0x549   :  { %v2077_v54 = vpop.f32.mrf.mxu0 }
 0x54a   :  { %v2078_v28 = vadd.f32 %v2077_v54, %v2029_v0 }
 0x54c   :  { %2117 = vst [vmem:[%s3959_s8] sm:$0xff] %v2078_v28  ;;  %v2045_v33 = vpop.f32.mrf.mxu3 }
 0x54d   :  { %v2046_v39 = vadd.f32 %v3885_v1, %v2045_v33 }
 0x551   :  { %v2079_v26 = vpop.f32.mrf.mxu0 }
 0x552   :  { %v2080_v45 = vadd.f32 %v2079_v26, %v2031_v61 }
 0x554   :  { %2118 = vst [vmem:[%s3959_s8 + $0x8] sm:$0xff] %v2080_v45  ;;  %v2048_v59 = vpop.f32.mrf.mxu3 }
 0x555   :  { %v2049_v12 = vadd.f32 %v3885_v1, %v2048_v59 }
 0x559   :  { %v2082_v47 = vpop.f32.mrf.mxu0 }
 0x55a   :  { %v2083_v55 = vadd.f32 %v2082_v47, %v2034_v15 }
 0x55c   :  { %2119 = vst [vmem:[%s3959_s8 + $0x10] sm:$0xff] %v2083_v55  ;;  %v2050_v21 = vpop.f32.mrf.mxu3 }
 0x55d   :  { %v2051_v24 = vadd.f32 %v3885_v1, %v2050_v21 }
 0x561   :  { %v2084_v13 = vpop.f32.mrf.mxu0 }
 0x562   :  { %v2085_v11 = vadd.f32 %v2084_v13, %v2036_v48 }
 0x564   :  { %2120 = vst [vmem:[%s3959_s8 + $0x18] sm:$0xff] %v2085_v11  ;;  %v2053_v52 = vpop.f32.mrf.mxu3 }
 0x565   :  { %v2054_v46 = vadd.f32 %v3885_v1, %v2053_v52 }
 0x569   :  { %v2087_v50 = vpop.f32.mrf.mxu0 }
 0x56a   :  { %v2088_v53 = vadd.f32 %v2087_v50, %v2039_v7 }
 0x56c   :  { %2121 = vst [vmem:[%s3959_s8 + $0x20] sm:$0xff] %v2088_v53  ;;  %v2055_v42 = vpop.f32.mrf.mxu3 }
 0x56d   :  { %v2056_v49 = vadd.f32 %v3885_v1, %v2055_v42 }
 0x571   :  { %v2089_v56 = vpop.f32.mrf.mxu0 }
 0x572   :  { %v2090_v57 = vadd.f32 %v2089_v56, %v2041_v63 }
 0x574   :  { %2122 = vst [vmem:[%s3959_s8 + $0x28] sm:$0xff] %v2090_v57  ;;  %v2058_v58 = vpop.f32.mrf.mxu3 }
 0x575   :  { %v2059_v23 = vadd.f32 %v3885_v1, %v2058_v58 }
 0x579   :  { %v2092_v20 = vpop.f32.mrf.mxu0 }
 0x57a   :  { %v2093_v10 = vadd.f32 %v2092_v20, %v2044_v22 }
 0x57c   :  { %2123 = vst [vmem:[%s3959_s8 + $0x30] sm:$0xff] %v2093_v10  ;;  %v2060_v4 = vpop.f32.mrf.mxu3 }
 0x57d   :  { %v2061_v44 = vadd.f32 %v3885_v1, %v2060_v4 }
 0x581   :  { %v2094_v6 = vpop.f32.mrf.mxu0 }
 0x582   :  { %v2095_v37 = vadd.f32 %v2094_v6, %v2046_v39 }
 0x584   :  { %2124 = vst [vmem:[%s3959_s8 + $0x38] sm:$0xff] %v2095_v37  ;;  %v2063_v36 = vpop.f32.mrf.mxu3 }
 0x585   :  { %v2064_v43 = vadd.f32 %v3885_v1, %v2063_v36 }
 0x589   :  { %v2097_v19 = vpop.f32.mrf.mxu0 }
 0x58a   :  { %v2098_v16 = vadd.f32 %v2097_v19, %v2049_v12 }
 0x58c   :  { %2125 = vst [vmem:[%s3959_s8 + $0x40] sm:$0xff] %v2098_v16  ;;  %v2065_v18 = vpop.f32.mrf.mxu3 }
 0x58d   :  { %v2066_v62 = vadd.f32 %v3885_v1, %v2065_v18 }
 0x591   :  { %v2099_v60 = vpop.f32.mrf.mxu0 }
 0x592   :  { %v2100_v51 = vadd.f32 %v2099_v60, %v2051_v24 }
 0x594   :  { %2126 = vst [vmem:[%s3959_s8 + $0x48] sm:$0xff] %v2100_v51 }
 0x599   :  { %v2102_v27 = vpop.f32.mrf.mxu0 }
 0x59a   :  { %v2103_v14 = vadd.f32 %v2102_v27, %v2054_v46 }
 0x59c   :  { %2127 = vst [vmem:[%s3959_s8 + $0x50] sm:$0xff] %v2103_v14 }
 0x5a1   :  { %v2104_v25 = vpop.f32.mrf.mxu0 }
 0x5a2   :  { %v2105_v31 = vadd.f32 %v2104_v25, %v2056_v49 }
 0x5a4   :  { %2128 = vst [vmem:[%s3959_s8 + $0x58] sm:$0xff] %v2105_v31 }
 0x5a9   :  { %v2107_v17 = vpop.f32.mrf.mxu0 }
 0x5aa   :  { %v2108_v9 = vadd.f32 %v2107_v17, %v2059_v23 }
 0x5ac   :  { %2129 = vst [vmem:[%s3959_s8 + $0x60] sm:$0xff] %v2108_v9 }
 0x5b1   :  { %v2109_v38 = vpop.f32.mrf.mxu0 }
 0x5b2   :  { %v2110_v34 = vadd.f32 %v2109_v38, %v2061_v44 }
 0x5b4   :  { %2130 = vst [vmem:[%s3959_s8 + $0x68] sm:$0xff] %v2110_v34 }
 0x5b9   :  { %v2112_v5 = vpop.f32.mrf.mxu0 }
 0x5ba   :  { %v2113_v30 = vadd.f32 %v2112_v5, %v2064_v43 }
 0x5bc   :  { %2131 = vst [vmem:[%s3959_s8 + $0x70] sm:$0xff] %v2113_v30 }
 0x5c1   :  { %v2114_v32 = vpop.f32.mrf.mxu0 }
 0x5c2   :  { %v2115_v3 = vadd.f32 %v2114_v32, %v2066_v62 }
 0x5c4   :  { %2132 = vst [vmem:[%s3959_s8 + $0x78] sm:$0xff] %v2115_v3 }
 0x5c5   :  { %2137 = vsyncmov [#allocation5] }
 0x5c8   :  { %s2138_s28 = vpop.sfrf %2137 }
 0x5c9   :  { %p2499_p0 = scmp.ne.s32.totalorder %s2138_s28, 0 }
 0x5cb   :  { %2142 = shalt.err (%p2499_p0)  }

</bundles_post_ra>
